<compile_context>
chip_gen: v7x
topology: tpu7x:2x2x1
jax: 0.10.0
libtpu: 0.0.40
codegen_flags: <defaults>
</compile_context>

<pallas_src>
import functools
import math

import jax
import jax.numpy as jnp
from jax.experimental import pallas as pl
from jax.experimental.pallas import tpu as pltpu

GN_EPS = 1e-5  # torch.nn.GroupNorm default


def _gn_rows(x, gamma, beta):
    """GroupNorm(num_groups=1) on a 2-D (rows, C) tensor: per-row stats over channels.

    Single-pass form: mean and E[x^2] are independent reductions, var = E[x^2]-mean^2.
    """
    mean = jnp.mean(x, axis=-1, keepdims=True)
    ex2 = jnp.mean(x * x, axis=-1, keepdims=True)
    var = jnp.maximum(ex2 - mean * mean, 0.0)
    return (x - mean) * jax.lax.rsqrt(var + GN_EPS) * gamma + beta


# ----------------------------------------------------------------------------
# Fused Pallas kernel: the whole LS2LS forward for one lane graph per grid step
# ----------------------------------------------------------------------------
def _ls2ls_kernel(feat_ref, adj_ref, wcat_ref, wctr2_ref, gn_ref, out_ref, msg_ref,
                  *, n_blk, n_rel, n_nodes, n_map):
    """Resident blocks (batch dim squeezed by the BlockSpec):

      feat_ref  : (N, C)               f32   node features of this graph
      adj_ref   : (N, n_rel*N)         bf16  [I | A_rel1 | A_rel2 | ...] (edge counts)
      wcat_ref  : (n_blk, C, n_rel*C)  bf16  [W_ctr | W_rel1 | ...] per block (x @ W)
      wctr2_ref : (n_blk, C, C)        bf16  'ctr2' linear weights (x @ W layout)
      gn_ref    : (n_blk*4, C)         f32   [g_norm, b_norm, g_ctr2, b_ctr2] per block
      out_ref   : (N, C)               f32
      msg_ref   : (n_rel*N, C)         bf16  VMEM scratch for the restacked messages
    """
    res = feat_ref[...]                 # residual = original input for every block
    feat = res
    for i in range(n_blk):
        # ---- message passing as two fat MXU ops (bf16 operands, f32 accumulate) ----
        # msg[:, e*C:(e+1)*C] = feat @ W_e for every relation (ctr == relation 0).
        msg = jnp.dot(feat.astype(jnp.bfloat16), wcat_ref[i],
                      preferred_element_type=jnp.float32)          # (N, n_rel*C) f32
        # Restack to (n_rel*N, C) at 8-sublane-aligned offsets e*N so the aggregation
        # is a single contraction-dense matmul (K = n_rel*N).
        for e in range(n_rel):
            msg_ref[e * n_nodes:(e + 1) * n_nodes, :] = (
                msg[:, e * n_map:(e + 1) * n_map].astype(jnp.bfloat16))
        # temp[n] = sum_e sum_v A_e[n, v] * (feat[v] @ W_e)  == torch index_add_
        temp = jnp.dot(adj_ref[...], msg_ref[...],
                       preferred_element_type=jnp.float32)          # (N, C) f32
        # ---- GN -> ReLU -> ctr2 Linear -> GN -> +res -> ReLU (all f32 elementwise) ----
        x = _gn_rows(temp, gn_ref[4 * i + 0:4 * i + 1, :], gn_ref[4 * i + 1:4 * i + 2, :])
        x = jnp.maximum(x, 0.0)
        x = jnp.dot(x.astype(jnp.bfloat16), wctr2_ref[i],
                    preferred_element_type=jnp.float32)
        x = _gn_rows(x, gn_ref[4 * i + 2:4 * i + 3, :], gn_ref[4 * i + 3:4 * i + 4, :])
        feat = jnp.maximum(x + res, 0.0)
    out_ref[...] = feat.astype(out_ref.dtype)


def ls2ls_forward(packed, feats, adjs):
    """feats: (B, N, C) f32; adjs: (B, N, n_rel*N) bf16 ([I | A_e ...] per graph)."""
    b, n, c = feats.shape
    n_blk = packed["wcat"].shape[0]
    n_rel = packed["wcat"].shape[-1] // c
    kern = functools.partial(_ls2ls_kernel, n_blk=n_blk, n_rel=n_rel,
                             n_nodes=n, n_map=c)
    return pl.pallas_call(
        kern,
        out_shape=jax.ShapeDtypeStruct((b, n, c), jnp.float32),
        grid_spec=pltpu.PrefetchScalarGridSpec(
            num_scalar_prefetch=0,
            grid=(b,),                                   # one independent graph / step
            in_specs=[
                pl.BlockSpec((None, n, c), lambda g: (g, 0, 0)),            # feat
                pl.BlockSpec((None, n, n_rel * n), lambda g: (g, 0, 0)),    # adjacency
                pl.BlockSpec((n_blk, c, n_rel * c), lambda g: (0, 0, 0)),   # W_cat
                pl.BlockSpec((n_blk, c, c), lambda g: (0, 0, 0)),           # W_ctr2
                pl.BlockSpec((n_blk * 4, c), lambda g: (0, 0)),             # GN params
            ],
            out_specs=pl.BlockSpec((None, n, c), lambda g: (g, 0, 0)),
            scratch_shapes=[pltpu.VMEM((n_rel * n, c), jnp.bfloat16)],
        ),
        compiler_params=pltpu.CompilerParams(
            # graphs are independent -> shard across both v7x TensorCores
            dimension_semantics=("parallel",)),
    )(feats.astype(jnp.float32), adjs, packed["wcat"], packed["wctr2"], packed["gn"])


# ----------------------------------------------------------------------------
# Graph / parameter construction + packing (wrapper-side glue)
# ----------------------------------------------------------------------------
def build_adjacency_cat(graphs, rel_keys, n_nodes):
    """(B, N, (1+len(rel_keys))*N): identity ('ctr') then per-relation count adjacency.

    Duplicate edges accumulate, matching torch index_add_.  Counts are small integers,
    exact in bf16.
    """
    eye = jnp.eye(n_nodes, dtype=jnp.float32)
    mats = []
    for g in graphs:
        blocks = [eye]
        for k in rel_keys:
            u, v = g[k]["u"], g[k]["v"]
            a = jnp.zeros((n_nodes, n_nodes), jnp.float32)
            if u.shape[0] > 0:
                a = a.at[u, v].add(1.0)
            blocks.append(a)
        mats.append(jnp.concatenate(blocks, axis=1))
    return jnp.stack(mats, axis=0).astype(jnp.bfloat16)


def make_params(key, n_map, n_blk, edge_keys):
    """Random parameters shaped like the PyTorch module (weights stored as x@W)."""
    def linear_w(k):
        # nn.Linear(n_map, n_map, bias=False): torch weight (out, in); store transpose.
        w = jax.random.normal(k, (n_map, n_map), jnp.float32) / math.sqrt(n_map)
        return jnp.transpose(w)

    raw = {}
    for name in ["ctr", "ctr2"] + list(edge_keys):
        ws = []
        for _ in range(n_blk):
            key, sub = jax.random.split(key)
            ws.append(linear_w(sub))
        raw[name] = jnp.stack(ws, axis=0)                     # (n_blk, C, C)
    for gname in ["gn_norm", "gn_ctr2"]:
        gs, bs = [], []
        for _ in range(n_blk):
            key, kg, kb = jax.random.split(key, 3)
            gs.append(1.0 + 0.1 * jax.random.normal(kg, (n_map,), jnp.float32))
            bs.append(0.1 * jax.random.normal(kb, (n_map,), jnp.float32))
        raw[gname + "_g"] = jnp.stack(gs, axis=0)             # (n_blk, C)
        raw[gname + "_b"] = jnp.stack(bs, axis=0)
    return raw


def pack_params(raw, rel_keys):
    """Concatenate per-relation weights (ctr first) and flatten GN params to 2-D."""
    n_blk, c = raw["ctr"].shape[0], raw["ctr"].shape[-1]
    wcat = jnp.concatenate([raw["ctr"]] + [raw[k] for k in rel_keys], axis=-1)
    gn = jnp.stack([raw["gn_norm_g"], raw["gn_norm_b"],
                    raw["gn_ctr2_g"], raw["gn_ctr2_b"]], axis=1)   # (n_blk, 4, C)
    return {
        "wcat": wcat.astype(jnp.bfloat16),          # (n_blk, C, n_rel*C)
        "wctr2": raw["ctr2"].astype(jnp.bfloat16),  # (n_blk, C, C)
        "gn": gn.reshape(n_blk * 4, c),             # (n_blk*4, C) f32, one VMEM tile
    }


def make_graph(key, edge_keys, n_nodes, n_edges):
    graph = {}
    for k in edge_keys:
        key, ku, kv = jax.random.split(key, 3)
        if k == "right":
            # exercise the empty-relation path (torch guards on len(u) > 0)
            u = jnp.zeros((0,), jnp.int32)
            v = jnp.zeros((0,), jnp.int32)
        else:
            u = jax.random.randint(ku, (n_edges,), 0, n_nodes, dtype=jnp.int32)
            v = jax.random.randint(kv, (n_edges,), 0, n_nodes, dtype=jnp.int32)
        graph[k] = {"u": u, "v": v}
    return graph


# ----------------------------------------------------------------------------
# Pure-JAX references
# ----------------------------------------------------------------------------
def ls2ls_reference_scatter(raw, feat, graph, edge_keys, n_blk):
    """Exact f32 reference with the original gather / index_add_ semantics."""
    res = feat
    for i in range(n_blk):
        temp = feat @ raw["ctr"][i]
        for k in edge_keys:
            u, v = graph[k]["u"], graph[k]["v"]
            if u.shape[0] > 0:
                temp = temp.at[u].add(feat[v] @ raw[k][i])
        x = _gn_rows(temp, raw["gn_norm_g"][i], raw["gn_norm_b"][i])
        x = jnp.maximum(x, 0.0)
        x = x @ raw["ctr2"][i]
        x = _gn_rows(x, raw["gn_ctr2_g"][i], raw["gn_ctr2_b"][i])
        feat = jnp.maximum(x + res, 0.0)
    return feat


def ls2ls_reference_dense_bf16(packed, feat, adj, n_blk, n_rel, n_map):
    """Pure-JAX replica of the kernel's exact math (dense adjacency, bf16 operands)."""
    res = feat
    x = feat
    for i in range(n_blk):
        msg = jnp.dot(x.astype(jnp.bfloat16), packed["wcat"][i],
                      preferred_element_type=jnp.float32)
        msg_stack = jnp.concatenate(
            [msg[:, e * n_map:(e + 1) * n_map] for e in range(n_rel)],
            axis=0).astype(jnp.bfloat16)
        temp = jnp.dot(adj, msg_stack, preferred_element_type=jnp.float32)
        y = _gn_rows(temp, packed["gn"][4 * i + 0], packed["gn"][4 * i + 1])
        y = jnp.maximum(y, 0.0)
        y = jnp.dot(y.astype(jnp.bfloat16), packed["wctr2"][i],
                    preferred_element_type=jnp.float32)
        y = _gn_rows(y, packed["gn"][4 * i + 2], packed["gn"][4 * i + 3])
        x = jnp.maximum(y + res, 0.0)
    return x


# ----------------------------------------------------------------------------
if __name__ == "__main__":
    N_NODES = 64        # lane segments per graph
    N_LS = 32           # config['n_ls'] (hidden width n_map)
    N_SCALES_LS = 2     # config['n_scales_ls']
    N_BLK = 2           # n_blk
    N_EDGES = 96        # edges per (non-empty) relation type
    BATCH = 2           # independent lane graphs -> "parallel" grid axis

    edge_keys = []
    for s in range(N_SCALES_LS):
        edge_keys += [f"pre{s}", f"suc{s}"]
    edge_keys += ["left", "right"]

    root = jax.random.PRNGKey(0)
    k_params, k_graph, k_feat = jax.random.split(root, 3)

    raw = make_params(k_params, N_LS, N_BLK, edge_keys)

    graphs = []
    gk = k_graph
    for _ in range(BATCH):
        gk, sub = jax.random.split(gk)
        graphs.append(make_graph(sub, edge_keys, N_NODES, N_EDGES))
    feats = jax.random.normal(k_feat, (BATCH, N_NODES, N_LS), jnp.float32)

    # Trace-time drop of relations that are empty in every graph ('right' here);
    # matches torch's len(u) > 0 guard (a zero adjacency contributes nothing).
    rel_keys = [k for k in edge_keys
                if any(g[k]["u"].shape[0] > 0 for g in graphs)]
    n_rel = 1 + len(rel_keys)   # +1 for 'ctr' (identity adjacency)

    adjs = build_adjacency_cat(graphs, rel_keys, N_NODES)     # (B, N, n_rel*N) bf16
    packed = pack_params(raw, rel_keys)

    fwd = jax.jit(ls2ls_forward)
    out = jax.block_until_ready(fwd(packed, feats, adjs))

    assert out.shape == (BATCH, N_NODES, N_LS), out.shape
    assert bool(jnp.all(jnp.isfinite(out)))

    for b in range(BATCH):
        # 1) Tight check against a pure-JAX replica of the kernel's exact math
        #    (same dense formulation, same bf16 rounding points, f32 accumulate).
        ref_exact = ls2ls_reference_dense_bf16(packed, feats[b], adjs[b],
                                               N_BLK, n_rel, N_LS)
        assert bool(jnp.allclose(out[b], ref_exact, rtol=5e-3, atol=5e-3)), \
            float(jnp.max(jnp.abs(out[b] - ref_exact)))
        # 2) Semantic check against the original f32 gather / index_add_ forward;
        #    tolerance budget covers bf16 MXU-operand rounding (~2^-8 relative).
        ref_f32 = ls2ls_reference_scatter(raw, feats[b], graphs[b], edge_keys, N_BLK)
        rel_err = float(jnp.linalg.norm(out[b] - ref_f32) /
                        jnp.linalg.norm(ref_f32))
        assert rel_err < 3e-2, rel_err

    print("KERNEL_OK")
</pallas_src>

<mosaic_0001>
module attributes {stable_mosaic.version = 11 : i64} {
  func.func @_ls2ls_kernel(%arg0: i32, %arg1: memref<1x64x32xf32, #tpu.memory_space<vmem>>, %arg2: memref<1x64x384xbf16, #tpu.memory_space<vmem>>, %arg3: memref<2x32x192xbf16, #tpu.memory_space<vmem>>, %arg4: memref<2x32x32xbf16, #tpu.memory_space<vmem>>, %arg5: memref<8x32xf32, #tpu.memory_space<vmem>>, %arg6: memref<1x64x32xf32, #tpu.memory_space<vmem>>, %arg7: memref<384x32xbf16, #tpu.memory_space<vmem>>) attributes {dimension_semantics = [#tpu.dimension_semantics<parallel>], iteration_bounds = array<i64: 2>, scalar_prefetch = 0 : i64, scratch_operands = 1 : i64, tpu.core_type = #tpu.core_type<tc>, window_params = [{transform_indices = @transform_0, window_bounds = array<i64: 1, 64, 32>}, {transform_indices = @transform_1, window_bounds = array<i64: 1, 64, 384>}, {pipeline_mode = #tpu.pipeline_mode<synchronous>, transform_indices = @transform_2, window_bounds = array<i64: 2, 32, 192>}, {pipeline_mode = #tpu.pipeline_mode<synchronous>, transform_indices = @transform_3, window_bounds = array<i64: 2, 32, 32>}, {pipeline_mode = #tpu.pipeline_mode<synchronous>, transform_indices = @transform_4, window_bounds = array<i64: 8, 32>}, {transform_indices = @transform_5, window_bounds = array<i64: 1, 64, 32>}]} {
    %c0 = arith.constant 0 : index
    %c0_0 = arith.constant 0 : index
    %c0_1 = arith.constant 0 : index
    %0 = vector.load %arg1[%c0, %c0_0, %c0_1] : memref<1x64x32xf32, #tpu.memory_space<vmem>>, vector<1x64x32xf32>
    %1 = vector.shape_cast %0 : vector<1x64x32xf32> to vector<64x32xf32>
    %2 = arith.truncf %1 : vector<64x32xf32> to vector<64x32xbf16>
    %c0_2 = arith.constant 0 : index
    %c0_3 = arith.constant 0 : index
    %c0_4 = arith.constant 0 : index
    %3 = vector.load %arg3[%c0_2, %c0_3, %c0_4] : memref<2x32x192xbf16, #tpu.memory_space<vmem>>, vector<1x32x192xbf16>
    %4 = vector.shape_cast %3 : vector<1x32x192xbf16> to vector<32x192xbf16>
    %cst = arith.constant dense<0.000000e+00> : vector<64x192xf32>
    %5 = tpu.matmul %2, %4, %cst {dimension_numbers = #tpu.dot_dimension_numbers<[1], [0], [0], [1], [0, 0, 1, 1], [], []>} : vector<64x32xbf16>, vector<32x192xbf16>, vector<64x192xf32> -> vector<64x192xf32>
    %6 = vector.extract_strided_slice %5 {offsets = [0, 0], sizes = [64, 32], strides = [1, 1]} : vector<64x192xf32> to vector<64x32xf32>
    %7 = arith.truncf %6 : vector<64x32xf32> to vector<64x32xbf16>
    %c0_5 = arith.constant 0 : index
    %c0_6 = arith.constant 0 : index
    %8 = vector.load %arg7[%c0_5, %c0_6] : memref<384x32xbf16, #tpu.memory_space<vmem>>, vector<64x32xbf16>
    tpu.vector_store %arg7[%c0_5, %c0_6], %7 {strides = array<i32>} : memref<384x32xbf16, #tpu.memory_space<vmem>>, vector<64x32xbf16>,
    %9 = vector.extract_strided_slice %5 {offsets = [0, 32], sizes = [64, 32], strides = [1, 1]} : vector<64x192xf32> to vector<64x32xf32>
    %10 = arith.truncf %9 : vector<64x32xf32> to vector<64x32xbf16>
    %c64 = arith.constant 64 : index
    %c0_7 = arith.constant 0 : index
    %11 = vector.load %arg7[%c64, %c0_7] : memref<384x32xbf16, #tpu.memory_space<vmem>>, vector<64x32xbf16>
    tpu.vector_store %arg7[%c64, %c0_7], %10 {strides = array<i32>} : memref<384x32xbf16, #tpu.memory_space<vmem>>, vector<64x32xbf16>,
    %12 = vector.extract_strided_slice %5 {offsets = [0, 64], sizes = [64, 32], strides = [1, 1]} : vector<64x192xf32> to vector<64x32xf32>
    %13 = arith.truncf %12 : vector<64x32xf32> to vector<64x32xbf16>
    %c128 = arith.constant 128 : index
    %c0_8 = arith.constant 0 : index
    %14 = vector.load %arg7[%c128, %c0_8] : memref<384x32xbf16, #tpu.memory_space<vmem>>, vector<64x32xbf16>
    tpu.vector_store %arg7[%c128, %c0_8], %13 {strides = array<i32>} : memref<384x32xbf16, #tpu.memory_space<vmem>>, vector<64x32xbf16>,
    %15 = vector.extract_strided_slice %5 {offsets = [0, 96], sizes = [64, 32], strides = [1, 1]} : vector<64x192xf32> to vector<64x32xf32>
    %16 = arith.truncf %15 : vector<64x32xf32> to vector<64x32xbf16>
    %c192 = arith.constant 192 : index
    %c0_9 = arith.constant 0 : index
    %17 = vector.load %arg7[%c192, %c0_9] : memref<384x32xbf16, #tpu.memory_space<vmem>>, vector<64x32xbf16>
    tpu.vector_store %arg7[%c192, %c0_9], %16 {strides = array<i32>} : memref<384x32xbf16, #tpu.memory_space<vmem>>, vector<64x32xbf16>,
    %18 = vector.extract_strided_slice %5 {offsets = [0, 128], sizes = [64, 32], strides = [1, 1]} : vector<64x192xf32> to vector<64x32xf32>
    %19 = arith.truncf %18 : vector<64x32xf32> to vector<64x32xbf16>
    %c256 = arith.constant 256 : index
    %c0_10 = arith.constant 0 : index
    %20 = vector.load %arg7[%c256, %c0_10] : memref<384x32xbf16, #tpu.memory_space<vmem>>, vector<64x32xbf16>
    tpu.vector_store %arg7[%c256, %c0_10], %19 {strides = array<i32>} : memref<384x32xbf16, #tpu.memory_space<vmem>>, vector<64x32xbf16>,
    %21 = vector.extract_strided_slice %5 {offsets = [0, 160], sizes = [64, 32], strides = [1, 1]} : vector<64x192xf32> to vector<64x32xf32>
    %22 = arith.truncf %21 : vector<64x32xf32> to vector<64x32xbf16>
    %c320 = arith.constant 320 : index
    %c0_11 = arith.constant 0 : index
    %23 = vector.load %arg7[%c320, %c0_11] : memref<384x32xbf16, #tpu.memory_space<vmem>>, vector<64x32xbf16>
    tpu.vector_store %arg7[%c320, %c0_11], %22 {strides = array<i32>} : memref<384x32xbf16, #tpu.memory_space<vmem>>, vector<64x32xbf16>,
    %c0_12 = arith.constant 0 : index
    %c0_13 = arith.constant 0 : index
    %c0_14 = arith.constant 0 : index
    %24 = vector.load %arg2[%c0_12, %c0_13, %c0_14] : memref<1x64x384xbf16, #tpu.memory_space<vmem>>, vector<1x64x384xbf16>
    %25 = vector.shape_cast %24 : vector<1x64x384xbf16> to vector<64x384xbf16>
    %c0_15 = arith.constant 0 : index
    %c0_16 = arith.constant 0 : index
    %26 = vector.load %arg7[%c0_15, %c0_16] : memref<384x32xbf16, #tpu.memory_space<vmem>>, vector<384x32xbf16>
    %cst_17 = arith.constant dense<0.000000e+00> : vector<64x32xf32>
    %27 = tpu.matmul %25, %26, %cst_17 {dimension_numbers = #tpu.dot_dimension_numbers<[1], [0], [0], [1], [0, 0, 1, 1], [], []>} : vector<64x384xbf16>, vector<384x32xbf16>, vector<64x32xf32> -> vector<64x32xf32>
    %c0_18 = arith.constant 0 : index
    %c0_19 = arith.constant 0 : index
    %28 = vector.load %arg5[%c0_18, %c0_19] : memref<8x32xf32, #tpu.memory_space<vmem>>, vector<1x32xf32>
    %c1 = arith.constant 1 : index
    %c0_20 = arith.constant 0 : index
    %29 = vector.load %arg5[%c1, %c0_20] : memref<8x32xf32, #tpu.memory_space<vmem>>, vector<1x32xf32>
    %cst_21 = arith.constant dense<0.000000e+00> : vector<64xf32>
    %30 = vector.multi_reduction <add>, %27, %cst_21 [1] : vector<64x32xf32> to vector<64xf32>
    %31 = vector.shape_cast %30 : vector<64xf32> to vector<64x1xf32>
    %cst_22 = arith.constant 3.200000e+01 : f32
    %32 = vector.broadcast %cst_22 : f32 to vector<64x1xf32>
    %33 = arith.divf %31, %32 : vector<64x1xf32>
    %34 = arith.mulf %27, %27 : vector<64x32xf32>
    %cst_23 = arith.constant dense<0.000000e+00> : vector<64xf32>
    %35 = vector.multi_reduction <add>, %34, %cst_23 [1] : vector<64x32xf32> to vector<64xf32>
    %36 = vector.shape_cast %35 : vector<64xf32> to vector<64x1xf32>
    %cst_24 = arith.constant 3.200000e+01 : f32
    %37 = vector.broadcast %cst_24 : f32 to vector<64x1xf32>
    %38 = arith.divf %36, %37 : vector<64x1xf32>
    %39 = arith.mulf %33, %33 : vector<64x1xf32>
    %40 = arith.subf %38, %39 : vector<64x1xf32>
    %cst_25 = arith.constant 0.000000e+00 : f32
    %41 = vector.broadcast %cst_25 : f32 to vector<64x1xf32>
    %42 = arith.maximumf %40, %41 : vector<64x1xf32>
    %43 = vector.broadcast %33 : vector<64x1xf32> to vector<64x32xf32>
    %44 = arith.subf %27, %43 : vector<64x32xf32>
    %cst_26 = arith.constant 9.99999974E-6 : f32
    %45 = vector.broadcast %cst_26 : f32 to vector<64x1xf32>
    %46 = arith.addf %42, %45 : vector<64x1xf32>
    %47 = math.rsqrt %46 : vector<64x1xf32>
    %48 = vector.broadcast %47 : vector<64x1xf32> to vector<64x32xf32>
    %49 = arith.mulf %44, %48 : vector<64x32xf32>
    %50 = vector.broadcast %28 : vector<1x32xf32> to vector<64x32xf32>
    %51 = arith.mulf %49, %50 : vector<64x32xf32>
    %52 = vector.broadcast %29 : vector<1x32xf32> to vector<64x32xf32>
    %53 = arith.addf %51, %52 : vector<64x32xf32>
    %cst_27 = arith.constant 0.000000e+00 : f32
    %54 = vector.broadcast %cst_27 : f32 to vector<64x32xf32>
    %55 = arith.maximumf %53, %54 : vector<64x32xf32>
    %56 = arith.truncf %55 : vector<64x32xf32> to vector<64x32xbf16>
    %c0_28 = arith.constant 0 : index
    %c0_29 = arith.constant 0 : index
    %c0_30 = arith.constant 0 : index
    %57 = vector.load %arg4[%c0_28, %c0_29, %c0_30] : memref<2x32x32xbf16, #tpu.memory_space<vmem>>, vector<1x32x32xbf16>
    %58 = vector.shape_cast %57 : vector<1x32x32xbf16> to vector<32x32xbf16>
    %cst_31 = arith.constant dense<0.000000e+00> : vector<64x32xf32>
    %59 = tpu.matmul %56, %58, %cst_31 {dimension_numbers = #tpu.dot_dimension_numbers<[1], [0], [0], [1], [0, 0, 1, 1], [], []>} : vector<64x32xbf16>, vector<32x32xbf16>, vector<64x32xf32> -> vector<64x32xf32>
    %c2 = arith.constant 2 : index
    %c0_32 = arith.constant 0 : index
    %60 = vector.load %arg5[%c2, %c0_32] : memref<8x32xf32, #tpu.memory_space<vmem>>, vector<1x32xf32>
    %c3 = arith.constant 3 : index
    %c0_33 = arith.constant 0 : index
    %61 = vector.load %arg5[%c3, %c0_33] : memref<8x32xf32, #tpu.memory_space<vmem>>, vector<1x32xf32>
    %cst_34 = arith.constant dense<0.000000e+00> : vector<64xf32>
    %62 = vector.multi_reduction <add>, %59, %cst_34 [1] : vector<64x32xf32> to vector<64xf32>
    %63 = vector.shape_cast %62 : vector<64xf32> to vector<64x1xf32>
    %cst_35 = arith.constant 3.200000e+01 : f32
    %64 = vector.broadcast %cst_35 : f32 to vector<64x1xf32>
    %65 = arith.divf %63, %64 : vector<64x1xf32>
    %66 = arith.mulf %59, %59 : vector<64x32xf32>
    %cst_36 = arith.constant dense<0.000000e+00> : vector<64xf32>
    %67 = vector.multi_reduction <add>, %66, %cst_36 [1] : vector<64x32xf32> to vector<64xf32>
    %68 = vector.shape_cast %67 : vector<64xf32> to vector<64x1xf32>
    %cst_37 = arith.constant 3.200000e+01 : f32
    %69 = vector.broadcast %cst_37 : f32 to vector<64x1xf32>
    %70 = arith.divf %68, %69 : vector<64x1xf32>
    %71 = arith.mulf %65, %65 : vector<64x1xf32>
    %72 = arith.subf %70, %71 : vector<64x1xf32>
    %cst_38 = arith.constant 0.000000e+00 : f32
    %73 = vector.broadcast %cst_38 : f32 to vector<64x1xf32>
    %74 = arith.maximumf %72, %73 : vector<64x1xf32>
    %75 = vector.broadcast %65 : vector<64x1xf32> to vector<64x32xf32>
    %76 = arith.subf %59, %75 : vector<64x32xf32>
    %cst_39 = arith.constant 9.99999974E-6 : f32
    %77 = vector.broadcast %cst_39 : f32 to vector<64x1xf32>
    %78 = arith.addf %74, %77 : vector<64x1xf32>
    %79 = math.rsqrt %78 : vector<64x1xf32>
    %80 = vector.broadcast %79 : vector<64x1xf32> to vector<64x32xf32>
    %81 = arith.mulf %76, %80 : vector<64x32xf32>
    %82 = vector.broadcast %60 : vector<1x32xf32> to vector<64x32xf32>
    %83 = arith.mulf %81, %82 : vector<64x32xf32>
    %84 = vector.broadcast %61 : vector<1x32xf32> to vector<64x32xf32>
    %85 = arith.addf %83, %84 : vector<64x32xf32>
    %86 = arith.addf %85, %1 : vector<64x32xf32>
    %cst_40 = arith.constant 0.000000e+00 : f32
    %87 = vector.broadcast %cst_40 : f32 to vector<64x32xf32>
    %88 = arith.maximumf %86, %87 : vector<64x32xf32>
    %89 = arith.truncf %88 : vector<64x32xf32> to vector<64x32xbf16>
    %c1_41 = arith.constant 1 : index
    %c0_42 = arith.constant 0 : index
    %c0_43 = arith.constant 0 : index
    %90 = vector.load %arg3[%c1_41, %c0_42, %c0_43] : memref<2x32x192xbf16, #tpu.memory_space<vmem>>, vector<1x32x192xbf16>
    %91 = vector.shape_cast %90 : vector<1x32x192xbf16> to vector<32x192xbf16>
    %cst_44 = arith.constant dense<0.000000e+00> : vector<64x192xf32>
    %92 = tpu.matmul %89, %91, %cst_44 {dimension_numbers = #tpu.dot_dimension_numbers<[1], [0], [0], [1], [0, 0, 1, 1], [], []>} : vector<64x32xbf16>, vector<32x192xbf16>, vector<64x192xf32> -> vector<64x192xf32>
    %93 = vector.extract_strided_slice %92 {offsets = [0, 0], sizes = [64, 32], strides = [1, 1]} : vector<64x192xf32> to vector<64x32xf32>
    %94 = arith.truncf %93 : vector<64x32xf32> to vector<64x32xbf16>
    %c0_45 = arith.constant 0 : index
    %c0_46 = arith.constant 0 : index
    %95 = vector.load %arg7[%c0_45, %c0_46] : memref<384x32xbf16, #tpu.memory_space<vmem>>, vector<64x32xbf16>
    tpu.vector_store %arg7[%c0_45, %c0_46], %94 {strides = array<i32>} : memref<384x32xbf16, #tpu.memory_space<vmem>>, vector<64x32xbf16>,
    %96 = vector.extract_strided_slice %92 {offsets = [0, 32], sizes = [64, 32], strides = [1, 1]} : vector<64x192xf32> to vector<64x32xf32>
    %97 = arith.truncf %96 : vector<64x32xf32> to vector<64x32xbf16>
    %c64_47 = arith.constant 64 : index
    %c0_48 = arith.constant 0 : index
    %98 = vector.load %arg7[%c64_47, %c0_48] : memref<384x32xbf16, #tpu.memory_space<vmem>>, vector<64x32xbf16>
    tpu.vector_store %arg7[%c64_47, %c0_48], %97 {strides = array<i32>} : memref<384x32xbf16, #tpu.memory_space<vmem>>, vector<64x32xbf16>,
    %99 = vector.extract_strided_slice %92 {offsets = [0, 64], sizes = [64, 32], strides = [1, 1]} : vector<64x192xf32> to vector<64x32xf32>
    %100 = arith.truncf %99 : vector<64x32xf32> to vector<64x32xbf16>
    %c128_49 = arith.constant 128 : index
    %c0_50 = arith.constant 0 : index
    %101 = vector.load %arg7[%c128_49, %c0_50] : memref<384x32xbf16, #tpu.memory_space<vmem>>, vector<64x32xbf16>
    tpu.vector_store %arg7[%c128_49, %c0_50], %100 {strides = array<i32>} : memref<384x32xbf16, #tpu.memory_space<vmem>>, vector<64x32xbf16>,
    %102 = vector.extract_strided_slice %92 {offsets = [0, 96], sizes = [64, 32], strides = [1, 1]} : vector<64x192xf32> to vector<64x32xf32>
    %103 = arith.truncf %102 : vector<64x32xf32> to vector<64x32xbf16>
    %c192_51 = arith.constant 192 : index
    %c0_52 = arith.constant 0 : index
    %104 = vector.load %arg7[%c192_51, %c0_52] : memref<384x32xbf16, #tpu.memory_space<vmem>>, vector<64x32xbf16>
    tpu.vector_store %arg7[%c192_51, %c0_52], %103 {strides = array<i32>} : memref<384x32xbf16, #tpu.memory_space<vmem>>, vector<64x32xbf16>,
    %105 = vector.extract_strided_slice %92 {offsets = [0, 128], sizes = [64, 32], strides = [1, 1]} : vector<64x192xf32> to vector<64x32xf32>
    %106 = arith.truncf %105 : vector<64x32xf32> to vector<64x32xbf16>
    %c256_53 = arith.constant 256 : index
    %c0_54 = arith.constant 0 : index
    %107 = vector.load %arg7[%c256_53, %c0_54] : memref<384x32xbf16, #tpu.memory_space<vmem>>, vector<64x32xbf16>
    tpu.vector_store %arg7[%c256_53, %c0_54], %106 {strides = array<i32>} : memref<384x32xbf16, #tpu.memory_space<vmem>>, vector<64x32xbf16>,
    %108 = vector.extract_strided_slice %92 {offsets = [0, 160], sizes = [64, 32], strides = [1, 1]} : vector<64x192xf32> to vector<64x32xf32>
    %109 = arith.truncf %108 : vector<64x32xf32> to vector<64x32xbf16>
    %c320_55 = arith.constant 320 : index
    %c0_56 = arith.constant 0 : index
    %110 = vector.load %arg7[%c320_55, %c0_56] : memref<384x32xbf16, #tpu.memory_space<vmem>>, vector<64x32xbf16>
    tpu.vector_store %arg7[%c320_55, %c0_56], %109 {strides = array<i32>} : memref<384x32xbf16, #tpu.memory_space<vmem>>, vector<64x32xbf16>,
    %c0_57 = arith.constant 0 : index
    %c0_58 = arith.constant 0 : index
    %c0_59 = arith.constant 0 : index
    %111 = vector.load %arg2[%c0_57, %c0_58, %c0_59] : memref<1x64x384xbf16, #tpu.memory_space<vmem>>, vector<1x64x384xbf16>
    %112 = vector.shape_cast %111 : vector<1x64x384xbf16> to vector<64x384xbf16>
    %c0_60 = arith.constant 0 : index
    %c0_61 = arith.constant 0 : index
    %113 = vector.load %arg7[%c0_60, %c0_61] : memref<384x32xbf16, #tpu.memory_space<vmem>>, vector<384x32xbf16>
    %cst_62 = arith.constant dense<0.000000e+00> : vector<64x32xf32>
    %114 = tpu.matmul %112, %113, %cst_62 {dimension_numbers = #tpu.dot_dimension_numbers<[1], [0], [0], [1], [0, 0, 1, 1], [], []>} : vector<64x384xbf16>, vector<384x32xbf16>, vector<64x32xf32> -> vector<64x32xf32>
    %c4 = arith.constant 4 : index
    %c0_63 = arith.constant 0 : index
    %115 = vector.load %arg5[%c4, %c0_63] : memref<8x32xf32, #tpu.memory_space<vmem>>, vector<1x32xf32>
    %c5 = arith.constant 5 : index
    %c0_64 = arith.constant 0 : index
    %116 = vector.load %arg5[%c5, %c0_64] : memref<8x32xf32, #tpu.memory_space<vmem>>, vector<1x32xf32>
    %cst_65 = arith.constant dense<0.000000e+00> : vector<64xf32>
    %117 = vector.multi_reduction <add>, %114, %cst_65 [1] : vector<64x32xf32> to vector<64xf32>
    %118 = vector.shape_cast %117 : vector<64xf32> to vector<64x1xf32>
    %cst_66 = arith.constant 3.200000e+01 : f32
    %119 = vector.broadcast %cst_66 : f32 to vector<64x1xf32>
    %120 = arith.divf %118, %119 : vector<64x1xf32>
    %121 = arith.mulf %114, %114 : vector<64x32xf32>
    %cst_67 = arith.constant dense<0.000000e+00> : vector<64xf32>
    %122 = vector.multi_reduction <add>, %121, %cst_67 [1] : vector<64x32xf32> to vector<64xf32>
    %123 = vector.shape_cast %122 : vector<64xf32> to vector<64x1xf32>
    %cst_68 = arith.constant 3.200000e+01 : f32
    %124 = vector.broadcast %cst_68 : f32 to vector<64x1xf32>
    %125 = arith.divf %123, %124 : vector<64x1xf32>
    %126 = arith.mulf %120, %120 : vector<64x1xf32>
    %127 = arith.subf %125, %126 : vector<64x1xf32>
    %cst_69 = arith.constant 0.000000e+00 : f32
    %128 = vector.broadcast %cst_69 : f32 to vector<64x1xf32>
    %129 = arith.maximumf %127, %128 : vector<64x1xf32>
    %130 = vector.broadcast %120 : vector<64x1xf32> to vector<64x32xf32>
    %131 = arith.subf %114, %130 : vector<64x32xf32>
    %cst_70 = arith.constant 9.99999974E-6 : f32
    %132 = vector.broadcast %cst_70 : f32 to vector<64x1xf32>
    %133 = arith.addf %129, %132 : vector<64x1xf32>
    %134 = math.rsqrt %133 : vector<64x1xf32>
    %135 = vector.broadcast %134 : vector<64x1xf32> to vector<64x32xf32>
    %136 = arith.mulf %131, %135 : vector<64x32xf32>
    %137 = vector.broadcast %115 : vector<1x32xf32> to vector<64x32xf32>
    %138 = arith.mulf %136, %137 : vector<64x32xf32>
    %139 = vector.broadcast %116 : vector<1x32xf32> to vector<64x32xf32>
    %140 = arith.addf %138, %139 : vector<64x32xf32>
    %cst_71 = arith.constant 0.000000e+00 : f32
    %141 = vector.broadcast %cst_71 : f32 to vector<64x32xf32>
    %142 = arith.maximumf %140, %141 : vector<64x32xf32>
    %143 = arith.truncf %142 : vector<64x32xf32> to vector<64x32xbf16>
    %c1_72 = arith.constant 1 : index
    %c0_73 = arith.constant 0 : index
    %c0_74 = arith.constant 0 : index
    %144 = vector.load %arg4[%c1_72, %c0_73, %c0_74] : memref<2x32x32xbf16, #tpu.memory_space<vmem>>, vector<1x32x32xbf16>
    %145 = vector.shape_cast %144 : vector<1x32x32xbf16> to vector<32x32xbf16>
    %cst_75 = arith.constant dense<0.000000e+00> : vector<64x32xf32>
    %146 = tpu.matmul %143, %145, %cst_75 {dimension_numbers = #tpu.dot_dimension_numbers<[1], [0], [0], [1], [0, 0, 1, 1], [], []>} : vector<64x32xbf16>, vector<32x32xbf16>, vector<64x32xf32> -> vector<64x32xf32>
    %c6 = arith.constant 6 : index
    %c0_76 = arith.constant 0 : index
    %147 = vector.load %arg5[%c6, %c0_76] : memref<8x32xf32, #tpu.memory_space<vmem>>, vector<1x32xf32>
    %c7 = arith.constant 7 : index
    %c0_77 = arith.constant 0 : index
    %148 = vector.load %arg5[%c7, %c0_77] : memref<8x32xf32, #tpu.memory_space<vmem>>, vector<1x32xf32>
    %cst_78 = arith.constant dense<0.000000e+00> : vector<64xf32>
    %149 = vector.multi_reduction <add>, %146, %cst_78 [1] : vector<64x32xf32> to vector<64xf32>
    %150 = vector.shape_cast %149 : vector<64xf32> to vector<64x1xf32>
    %cst_79 = arith.constant 3.200000e+01 : f32
    %151 = vector.broadcast %cst_79 : f32 to vector<64x1xf32>
    %152 = arith.divf %150, %151 : vector<64x1xf32>
    %153 = arith.mulf %146, %146 : vector<64x32xf32>
    %cst_80 = arith.constant dense<0.000000e+00> : vector<64xf32>
    %154 = vector.multi_reduction <add>, %153, %cst_80 [1] : vector<64x32xf32> to vector<64xf32>
    %155 = vector.shape_cast %154 : vector<64xf32> to vector<64x1xf32>
    %cst_81 = arith.constant 3.200000e+01 : f32
    %156 = vector.broadcast %cst_81 : f32 to vector<64x1xf32>
    %157 = arith.divf %155, %156 : vector<64x1xf32>
    %158 = arith.mulf %152, %152 : vector<64x1xf32>
    %159 = arith.subf %157, %158 : vector<64x1xf32>
    %cst_82 = arith.constant 0.000000e+00 : f32
    %160 = vector.broadcast %cst_82 : f32 to vector<64x1xf32>
    %161 = arith.maximumf %159, %160 : vector<64x1xf32>
    %162 = vector.broadcast %152 : vector<64x1xf32> to vector<64x32xf32>
    %163 = arith.subf %146, %162 : vector<64x32xf32>
    %cst_83 = arith.constant 9.99999974E-6 : f32
    %164 = vector.broadcast %cst_83 : f32 to vector<64x1xf32>
    %165 = arith.addf %161, %164 : vector<64x1xf32>
    %166 = math.rsqrt %165 : vector<64x1xf32>
    %167 = vector.broadcast %166 : vector<64x1xf32> to vector<64x32xf32>
    %168 = arith.mulf %163, %167 : vector<64x32xf32>
    %169 = vector.broadcast %147 : vector<1x32xf32> to vector<64x32xf32>
    %170 = arith.mulf %168, %169 : vector<64x32xf32>
    %171 = vector.broadcast %148 : vector<1x32xf32> to vector<64x32xf32>
    %172 = arith.addf %170, %171 : vector<64x32xf32>
    %173 = arith.addf %172, %1 : vector<64x32xf32>
    %cst_84 = arith.constant 0.000000e+00 : f32
    %174 = vector.broadcast %cst_84 : f32 to vector<64x32xf32>
    %175 = arith.maximumf %173, %174 : vector<64x32xf32>
    %c0_85 = arith.constant 0 : index
    %c0_86 = arith.constant 0 : index
    %c0_87 = arith.constant 0 : index
    %176 = vector.load %arg6[%c0_85, %c0_86, %c0_87] : memref<1x64x32xf32, #tpu.memory_space<vmem>>, vector<1x64x32xf32>
    %177 = vector.shape_cast %176 : vector<1x64x32xf32> to vector<64x32xf32>
    %178 = vector.shape_cast %175 : vector<64x32xf32> to vector<1x64x32xf32>
    tpu.vector_store %arg6[%c0_85, %c0_86, %c0_87], %178 {strides = array<i32>} : memref<1x64x32xf32, #tpu.memory_space<vmem>>, vector<1x64x32xf32>,
    return
  }
  func.func @transform_0(%arg0: i32) -> (i32, i32, i32) {
    %c0_i32 = arith.constant 0 : i32
    %c0_i32_0 = arith.constant 0 : i32
    %c0_i32_1 = arith.constant 0 : i32
    return %arg0, %c0_i32, %c0_i32_0 : i32, i32, i32
  }
  func.func @transform_1(%arg0: i32) -> (i32, i32, i32) {
    %c0_i32 = arith.constant 0 : i32
    %c0_i32_0 = arith.constant 0 : i32
    %c0_i32_1 = arith.constant 0 : i32
    return %arg0, %c0_i32, %c0_i32_0 : i32, i32, i32
  }
  func.func @transform_2(%arg0: i32) -> (i32, i32, i32) {
    %c0_i32 = arith.constant 0 : i32
    %c0_i32_0 = arith.constant 0 : i32
    %c0_i32_1 = arith.constant 0 : i32
    %c0_i32_2 = arith.constant 0 : i32
    return %c0_i32, %c0_i32_0, %c0_i32_1 : i32, i32, i32
  }
  func.func @transform_3(%arg0: i32) -> (i32, i32, i32) {
    %c0_i32 = arith.constant 0 : i32
    %c0_i32_0 = arith.constant 0 : i32
    %c0_i32_1 = arith.constant 0 : i32
    %c0_i32_2 = arith.constant 0 : i32
    return %c0_i32, %c0_i32_0, %c0_i32_1 : i32, i32, i32
  }
  func.func @transform_4(%arg0: i32) -> (i32, i32) {
    %c0_i32 = arith.constant 0 : i32
    %c0_i32_0 = arith.constant 0 : i32
    %c0_i32_1 = arith.constant 0 : i32
    return %c0_i32, %c0_i32_0 : i32, i32
  }
  func.func @transform_5(%arg0: i32) -> (i32, i32, i32) {
    %c0_i32 = arith.constant 0 : i32
    %c0_i32_0 = arith.constant 0 : i32
    %c0_i32_1 = arith.constant 0 : i32
    return %arg0, %c0_i32, %c0_i32_0 : i32, i32, i32
  }
}

</mosaic_0001>

<bundles_post_ra>
// kernel: ls2ls_forward.1
= control target key start
LH: loop header
LB: loop body
LE: loop exit
PB: predicated region body
PF: predicated region fallthrough
CT: control target
= control target key end

     0   :  { %10 = vsyncpa [#allocation4], 0  ;;  %s3395_s0 = inlined_call_operand.vmem [shape: f32[2,64,32], index: 0, kind: input, shape index: {}]   ;;  %s3396_s1 = inlined_call_operand.vmem [shape: bf16[2,64,384], index: 1, kind: input, shape index: {}]   ;;  %s3397_s2 = inlined_call_operand.hbm [shape: bf16[2,32,192], index: 2, kind: input, shape index: {}]   ;;  %s3398_s3 = inlined_call_operand.hbm [shape: bf16[2,32,32], index: 3, kind: input, shape index: {}]   ;;  %s3399_s4 = inlined_call_operand.vmem [shape: f32[8,32], index: 4, kind: input, shape index: {}]   ;;  %s3400_s5 = inlined_call_operand.vmem [shape: f32[2,64,32], index: 5, kind: output, shape index: {}]  }
   0x1   :  { %11 = vsyncpa [#allocation6], 0  ;;  %s2657_s18 = smov 0  }
   0x2 LB: > { %s2617_s19 = smov [#allocation3]   ;;  %s2663_s21 = sadd.s32 4294967295, %s2615_s18   ;;  %s2615_s18 = sphi %s2657_s18, %s17_s18  }
   0x3   : > { %s175_s20 = sshll.u32 %s2617_s19, 4  ;;  %p2115_p0 = scmp.ge.s32.totalorder %s2615_s18, 1  ;;  %s176_s20 = int_to_ptr.vmem [resolvable:$true] %s175_s20 }
   0x4   : > { %p163_p1 = scmp.lt.s32.totalorder %s2615_s18, 3  ;;  %p3401_p3 = scmp.eq.s32.totalorder %s2663_s21, 0 }
   0x5   : > { %s2618_s23 = smov [#allocation5]   ;;  %s2545_s28 = scalar_lea.hbm %s3397_s2, 1024 }
   0x6   : > { %p2667_p2 = pnand %p2115_p0, %p163_p1  ;;  %s188_s24 = sshll.u32 %s2618_s23, 4  ;;  %s2680_s24 = int_to_ptr.vmem [resolvable:$true] %s188_s24 }
   0x7   : > { %p2546_p6 = scmp.ne.s32.totalorder %s3397_s2, %s2545_s28  ;;  %p2552_p10 = scmp.lt.u32.totalorder %s2545_s28, %s3397_s2 }
   0x8   : > { %s3403_s22 = scalar_select %p2667_p2, 1, 0 }
   0x9   : > { %p2388_p4 = pneg %p2667_p2 }
   0xb   : > { %p2676_p5 = pnand %p3401_p3, %p2388_p4 }
   0xd   : > { %p2547_p7 = pneg %p2676_p5 }
   0xf   : > { %p2548_p8 = pnand %p2547_p7, %p2546_p6 }
  0x11   : > { %p2549_p9 = pneg %p2548_p8 }
  0x13   : > { %p2554_p11 = pnand %p2552_p10, %p2549_p9 }
  0x15   : > { %2557 = shalt.err (!%p2554_p11)
}
  0x16   : > { %s2558_s8 = scalar_lea.vmem %s176_s20, 1024  ;;  %p2566_p1 = scmp.lt.s32.totalorder %s176_s20, %s176_s20 }
  0x17   : > { %p2559_p12 = scmp.ne.s32.totalorder %s176_s20, %s2558_s8  ;;  %p2567_p4 = scmp.lt.s32.totalorder %s2558_s8, %s2558_s8 }
  0x19   : > { %p2561_p13 = pnand %p2559_p12, %p2547_p7  ;;  %p2568_p3 = por %p2567_p4, %p2566_p1 }
  0x1b   : > { %p2562_p0 = pneg %p2561_p13 }
  0x1d   : > { %p2569_p2 = pnand %p2568_p3, %p2562_p0 }
  0x1f   : > { %2572 = shalt.err (!%p2569_p2)
}
  0x20   : > { %s2619_s9 = smov 128   ;;  %s2620_s10 = smov 8  }
  0x21   : > { %2391 = dma.hbm_to_vmem [thread:$0]  (!%p2676_p5), %s3397_s2, 1024, %s176_s20, [#allocation4], %s2619_s9, %s2619_s9, %s2620_s10  }
  0x22   : > { %s2573_s15 = scalar_lea.hbm %s3398_s3, 512 }
  0x23   : > { %p2574_p6 = scmp.ne.s32.totalorder %s3398_s3, %s2573_s15  ;;  %p2580_p8 = scmp.lt.u32.totalorder %s2573_s15, %s3398_s3 }
  0x25   : > { %p2576_p2 = pnand %p2574_p6, %p2547_p7 }
  0x27   : > { %p2577_p3 = pneg %p2576_p2 }
  0x29   : > { %p2582_p9 = pnand %p2580_p8, %p2577_p3 }
  0x2b   : > { %2585 = shalt.err (!%p2582_p9)
}
  0x2c   : > { %s2586_s20 = scalar_lea.vmem %s2680_s24, 512  ;;  %p2594_p13 = scmp.lt.s32.totalorder %s2680_s24, %s2680_s24 }
  0x2d   : > { %p2587_p10 = scmp.ne.s32.totalorder %s2680_s24, %s2586_s20  ;;  %p2595_p0 = scmp.lt.s32.totalorder %s2586_s20, %s2586_s20 }
  0x2f   : > { %p2589_p11 = pnand %p2587_p10, %p2547_p7  ;;  %p2596_p1 = por %p2595_p0, %p2594_p13 }
  0x31   : > { %p2590_p12 = pneg %p2589_p11 }
  0x33   : > { %p2597_p4 = pnand %p2596_p1, %p2590_p12 }
  0x35   : > { %2600 = shalt.err (!%p2597_p4)
}
  0x36   : > { %s2621_s26 = smov 64   ;;  %s2622_s27 = smov 4  }
  0x37   : > { %2394 = dma.hbm_to_vmem [thread:$0]  (!%p2676_p5), %s3398_s3, 512, %s2680_s24, [#allocation6], %s2621_s26, %s2621_s26, %s2622_s27  }
  0x38   : > { %p3405_p6 = scmp.ne.s32.totalorder %s3403_s22, 0 }
  0x39   : > { %p3406_p7 = scmp.eq.s32.totalorder (!%p3405_p6), %s2663_s21, 0 }
  0x3a   : > { %223 = sbr.rel (%p3405_p6) target bundleno = 2483 (0x9b3), region = 40 }
  0x41   : > { %2606 = dma.done.wait (%p3406_p7), [#allocation4], 1024   ;;  %p3407_p2 = pmov %p3406_p7 }
  0x43   : > { %2608 = vsyncadd (%p3407_p2), [#allocation4], 4294966272  ;;  %p3408_p3 = pmov %p3407_p2 }
  0x44   : > { %p3409_p8 = pmov %p3407_p2 }
  0x45   : > { %2610 = dma.done.wait (%p3408_p3), [#allocation6], 512  }
  0x46   : > { %2612 = vsyncadd (%p3409_p8), [#allocation6], 4294966784  ;;  %p260_p9 = scmp.lt.s32.totalorder %s2663_s21, 1  ;;  %v2623_v0 = vmov 0   ;;  %v2417_v1 = vld [vmem:[#allocation3 + $0x4] ss:$8 sps:$4 sm:$0xff]  }
  0x47   : > { %357 = vmatprep.mubr.bf16.mxu0 %v2623_v0  ;;  %v2419_v2 = vld [vmem:[#allocation3] ss:$8 sps:$4 sm:$0xff]   ;;  %325 = vmatprep.subr.bf16.mxu0 %v2417_v1  ;;  %v2420_v3 = vld [vmem:[#allocation3 + $0x14] ss:$8 sps:$4 sm:$0xff]   ;;  %v2422_v4 = vld [vmem:[#allocation3 + $0x10] ss:$8 sps:$4 sm:$0xff]  }
  0x48   : > { %s3411_s21 = smov (!%p260_p9, %s2663_s21), 1  ;;  %326 = vmatpush1.bf16.msra.mxu0 %v2419_v2  ;;  %vm312_vm0 = vcmask 261120   ;;  %s2624_s10 = smov 64  }
  0x49   : > { %s2189_s22 = sshll.u32 %s3411_s21, 6  ;;  %s2379_s6 = smul.u32 96, %s3411_s21  ;;  %327 = vmatprep.subr.bf16.mxu0 %v2420_v3 }
  0x4a   : > { %s2750_s30 = scalar_lea.vmem %s3395_s0, %s2189_s22  ;;  %s2625_s11 = smov 32  }
  0x4b   : > { %v276_v5 = vld [vmem:[%s2750_s30] sm:$0xff]  ;;  %v277_v6 = vld [vmem:[%s2750_s30 + $0x8] sm:$0xff]  ;;  %s2758_s9 = scalar_lea.vmem %s3396_s1, %s2379_s6  ;;  %v278_v8 = vld [vmem:[%s2750_s30 + $0x10] sm:$0xff]  ;;  %s2626_s12 = smov 96  }
  0x4c   : > { %v284_v7 = vpack.c.bf16 %v277_v6, %v276_v5  ;;  %328 = vmatpush1.bf16.msra.mxu0 %v2422_v4  ;;  %v279_v9 = vld [vmem:[%s2750_s30 + $0x18] sm:$0xff]  ;;  %v280_v11 = vld [vmem:[%s2750_s30 + $0x20] sm:$0xff]  ;;  %v281_v12 = vld [vmem:[%s2750_s30 + $0x28] sm:$0xff] }
  0x4d   : > { %v285_v10 = vpack.c.bf16 %v279_v9, %v278_v8  ;;  %v286_v13 = vpack.c.bf16 %v281_v12, %v280_v11  ;;  %v282_v14 = vld [vmem:[%s2750_s30 + $0x30] sm:$0xff]  ;;  %v283_v15 = vld [vmem:[%s2750_s30 + $0x38] sm:$0xff] }
  0x4e   : > { %v287_v16 = vpack.c.bf16 %v283_v15, %v282_v14  ;;  %v2425_v45 = vld [vmem:[%s2758_s9 + $0x4] ss:$12 sps:$4 sm:$0xff]   ;;  %v2429_v46 = vld [vmem:[%s2758_s9 + $0x8] ss:$12 sps:$4 sm:$0xff]  }
  0x4f   : > { %2131 = vmatmul.mubr.msk.bf16.vlgmr.msra.gmra.mrb[0].mxu0 %vm312_vm0, %v284_v7  ;;  %622 = vmatprep.mubr.bf16.mxu1 %v2425_v45 }
  0x50   : > { %367 = vmatprep.mubr.bf16.mxu0 %v2623_v0 }
  0x57   : > { %2132 = vmatmul.mubr.msk.bf16.gmra.mrb[4].mxu0 %vm312_vm0, %v285_v10 }
  0x58   : > { %377 = vmatprep.mubr.bf16.mxu0 %v2623_v0 }
  0x5f   : > { %2133 = vmatmul.mubr.msk.bf16.gmra.mrb[8].mxu0 %vm312_vm0, %v286_v13 }
  0x60   : > { %387 = vmatprep.mubr.bf16.mxu0 %v2623_v0 }
  0x67   : > { %2134 = vmatmul.mubr.msk.bf16.gmra.mrb[12].mxu0 %vm312_vm0, %v287_v16 }
  0x68   : > { %2323 = vmatprep.mubr.bf16.mxu0 %v2429_v46 }
 0x122   : > { %v359_v17 = vpop.f32.mrb[0].mxu0 }
 0x123   : > { %v361_v18 = vpop.f32.mrb[1].mxu0 }
 0x124   : > { %v363_v19 = vpop.f32.mrb[2].mxu0 }
 0x125   : > { %v398_v20 = vpack.c.bf16 %v363_v19, %v359_v17  ;;  %v365_v21 = vpop.f32.mrb[3].mxu0  ;;  %v2423_v17 = vld [vmem:[%s2758_s9] ss:$12 sps:$4 sm:$0xff]  }
 0x126   : > { %v458_v22 = vpack.c.bf16 %v365_v21, %v361_v18  ;;  %v2426_v18 = vld [vmem:[%s2758_s9 + $0x1c] ss:$12 sps:$4 sm:$0xff]   ;;  %v2428_v21 = vld [vmem:[%s2758_s9 + $0x18] ss:$12 sps:$4 sm:$0xff]  }
 0x127   : > { %402 = vst.msk [vmem:[#allocation2] sm:$0xff] %vm312_vm0, %v398_v20  ;;  %426 = vrot.lane.b32.xlu0 %v398_v20, %s2624_s10 }
 0x128   : > { %462 = vst.msk [vmem:[#allocation2 + $0x80] sm:$0xff] %vm312_vm0, %v458_v22 }
 0x12a   : > { %v369_v23 = vpop.f32.mrb[4].mxu0 }
 0x12b   : > { %v371_v24 = vpop.f32.mrb[5].mxu0 }
 0x12c   : > { %v373_v25 = vpop.f32.mrb[6].mxu0 }
 0x12d   : > { %v399_v26 = vpack.c.bf16 %v373_v25, %v369_v23  ;;  %v375_v27 = vpop.f32.mrb[7].mxu0  ;;  %v2431_v23 = vld [vmem:[%s2758_s9 + $0x34] ss:$12 sps:$4 sm:$0xff]   ;;  %v2437_v25 = vld [vmem:[%s2758_s9 + $0x38] ss:$12 sps:$4 sm:$0xff]  }
 0x12e   : > { %v459_v28 = vpack.c.bf16 %v375_v27, %v371_v24  ;;  %v502_v50 = vld [vmem:[#allocation2] sm:$0xff]  ;;  %v2434_v27 = vld [vmem:[%s2758_s9 + $0x4c] ss:$12 sps:$4 sm:$0xff]  }
 0x12f   : > { %403 = vst.msk [vmem:[#allocation2 + $0x8] sm:$0xff] %vm312_vm0, %v399_v26  ;;  %428 = vrot.lane.b32.xlu0 %v399_v26, %s2624_s10  ;;  %v518_v29 = vld [vmem:[#allocation2 + $0x80] sm:$0xff] }
 0x130   : > { %463 = vst.msk [vmem:[#allocation2 + $0x88] sm:$0xff] %vm312_vm0, %v459_v28  ;;  %2307 = vmatprep.subr.bf16.mxu0 %v518_v29  ;;  %v2430_v24 = vld [vmem:[%s2758_s9 + $0x20] ss:$12 sps:$4 sm:$0xff]  }
 0x131   : > { %2308 = vmatpush3.bf16.msra.mxu0 %v518_v29  ;;  %v2436_v29 = vld [vmem:[%s2758_s9 + $0x48] ss:$12 sps:$4 sm:$0xff]  }
 0x132   : > { %v379_v30 = vpop.f32.mrb[8].mxu0 }
 0x133   : > { %442 = vrot.lane.b32.xlu0 %v398_v20, %s2625_s11  ;;  %v381_v31 = vpop.f32.mrb[9].mxu0 }
 0x134   : > { %v383_v32 = vpop.f32.mrb[10].mxu0 }
 0x135   : > { %v400_v33 = vpack.c.bf16 %v383_v32, %v379_v30  ;;  %v385_v34 = vpop.f32.mrb[11].mxu0 }
 0x136   : > { %v460_v35 = vpack.c.bf16 %v385_v34, %v381_v31  ;;  %v503_v55 = vld [vmem:[#allocation2 + $0x8] sm:$0xff] }
 0x137   : > { %404 = vst.msk [vmem:[#allocation2 + $0x10] sm:$0xff] %vm312_vm0, %v400_v33  ;;  %444 = vrot.lane.b32.xlu0 %v399_v26, %s2625_s11  ;;  %430 = vrot.lane.b32.xlu1 %v400_v33, %s2624_s10  ;;  %v519_v36 = vld [vmem:[#allocation2 + $0x88] sm:$0xff] }
 0x138   : > { %464 = vst.msk [vmem:[#allocation2 + $0x90] sm:$0xff] %vm312_vm0, %v460_v35  ;;  %2309 = vmatprep.subr.bf16.mxu0 %v519_v36 }
 0x139   : > { %2310 = vmatpush3.bf16.msra.mxu0 %v519_v36 }
 0x13a   : > { %v389_v37 = vpop.f32.mrb[12].mxu0 }
 0x13b   : > { %446 = vrot.lane.b32.xlu0 %v400_v33, %s2625_s11  ;;  %v391_v38 = vpop.f32.mrb[13].mxu0 }
 0x13c   : > { %v393_v39 = vpop.f32.mrb[14].mxu0 }
 0x13d   : > { %v401_v40 = vpack.c.bf16 %v393_v39, %v389_v37  ;;  %v395_v41 = vpop.f32.mrb[15].mxu0 }
 0x13e   : > { %v461_v42 = vpack.c.bf16 %v395_v41, %v391_v38  ;;  %v504_v60 = vld [vmem:[#allocation2 + $0x10] sm:$0xff] }
 0x13f   : > { %405 = vst.msk [vmem:[#allocation2 + $0x18] sm:$0xff] %vm312_vm0, %v401_v40  ;;  %470 = vrot.lane.b32.xlu0 %v458_v22, %s2626_s12  ;;  %432 = vrot.lane.b32.xlu1 %v401_v40, %s2624_s10  ;;  %v520_v43 = vld [vmem:[#allocation2 + $0x90] sm:$0xff] }
 0x140   : > { %465 = vst.msk [vmem:[#allocation2 + $0x98] sm:$0xff] %vm312_vm0, %v461_v42  ;;  %2311 = vmatprep.subr.bf16.mxu0 %v520_v43 }
 0x141   : > { %2312 = vmatpush3.bf16.msra.mxu0 %v520_v43 }
 0x143   : > { %416 = vrot.lane.b32.xlu0 %v401_v40, %s2626_s12  ;;  %410 = vrot.lane.b32.xlu1 %v398_v20, %s2626_s12 }
 0x146   : > { %v505_v4 = vld [vmem:[#allocation2 + $0x18] sm:$0xff] }
 0x147   : > { %474 = vrot.lane.b32.xlu0 %v460_v35, %s2626_s12  ;;  %412 = vrot.lane.b32.xlu1 %v399_v26, %s2626_s12  ;;  %v521_v44 = vld [vmem:[#allocation2 + $0x98] sm:$0xff] }
 0x148   : > { %2313 = vmatprep.subr.bf16.mxu0 %v521_v44  ;;  %v2433_v26 = vld [vmem:[%s2758_s9 + $0x30] ss:$12 sps:$4 sm:$0xff]  }
 0x149   : > { %2314 = vmatpush3.bf16.msra.mxu0 %v521_v44 }
 0x14b   : > { %414 = vrot.lane.b32.xlu1 %v400_v33, %s2626_s12 }
 0x14f   : > { %448 = vrot.lane.b32.xlu1 %v401_v40, %s2625_s11 }
 0x153   : > { %472 = vrot.lane.b32.xlu1 %v459_v28, %s2626_s12  ;;  %v2438_v28 = vld [vmem:[%s2758_s9 + $0x50] ss:$12 sps:$4 sm:$0xff]  }
 0x157   : > { %476 = vrot.lane.b32.xlu1 %v461_v42, %s2626_s12 }
 0x199   : > { %v427_v47 = vpop.permute.xlu0 %426 }
 0x19a   : > { %438 = vst.msk [vmem:[#allocation2 + $0x40] sm:$0xff] %vm312_vm0, %v427_v47 }
 0x1a1   : > { %v429_v48 = vpop.permute.xlu0 %428  ;;  %v510_v49 = vld [vmem:[#allocation2 + $0x40] sm:$0xff] }
 0x1a2   : > { %439 = vst.msk [vmem:[#allocation2 + $0x48] sm:$0xff] %vm312_vm0, %v429_v48  ;;  %2191 = vmatprep.subr.bf16.mxu1 %v510_v49 }
 0x1a3   : > { %2192 = vmatpush3.bf16.msra.mxu1 %v502_v50 }
 0x1a5   : > { %v443_v51 = vpop.permute.xlu0 %442 }
 0x1a6   : > { %454 = vst.msk [vmem:[#allocation2 + $0x60] sm:$0xff] %vm312_vm0, %v443_v51 }
 0x1a9   : > { %v445_v52 = vpop.permute.xlu0 %444  ;;  %v431_v53 = vpop.permute.xlu1 %430  ;;  %v511_v54 = vld [vmem:[#allocation2 + $0x48] sm:$0xff] }
 0x1aa   : > { %455 = vst.msk [vmem:[#allocation2 + $0x68] sm:$0xff] %vm312_vm0, %v445_v52  ;;  %440 = vst.msk [vmem:[#allocation2 + $0x50] sm:$0xff] %vm312_vm0, %v431_v53  ;;  %2193 = vmatprep.subr.bf16.mxu1 %v511_v54 }
 0x1ab   : > { %2194 = vmatpush3.bf16.msra.mxu1 %v503_v55 }
 0x1ad   : > { %v447_v56 = vpop.permute.xlu0 %446  ;;  %v514_v5 = vld [vmem:[#allocation2 + $0x60] sm:$0xff] }
 0x1ae   : > { %456 = vst.msk [vmem:[#allocation2 + $0x70] sm:$0xff] %vm312_vm0, %v447_v56 }
 0x1b1   : > { %v471_v57 = vpop.permute.xlu0 %470  ;;  %v433_v58 = vpop.permute.xlu1 %432  ;;  %v512_v59 = vld [vmem:[#allocation2 + $0x50] sm:$0xff]  ;;  %v515_v8 = vld [vmem:[#allocation2 + $0x68] sm:$0xff] }
 0x1b2   : > { %482 = vst.msk [vmem:[#allocation2 + $0xa0] sm:$0xff] %vm312_vm0, %v471_v57  ;;  %441 = vst.msk [vmem:[#allocation2 + $0x58] sm:$0xff] %vm312_vm0, %v433_v58  ;;  %2195 = vmatprep.subr.bf16.mxu1 %v512_v59 }
 0x1b3   : > { %2196 = vmatpush3.bf16.msra.mxu1 %v504_v60 }
 0x1b5   : > { %v417_v61 = vpop.permute.xlu0 %416  ;;  %v411_v62 = vpop.permute.xlu1 %410  ;;  %v516_v11 = vld [vmem:[#allocation2 + $0x70] sm:$0xff] }
 0x1b6   : > { %425 = vst.msk [vmem:[#allocation2 + $0x38] sm:$0xff] %vm312_vm0, %v417_v61  ;;  %422 = vst.msk [vmem:[#allocation2 + $0x20] sm:$0xff] %vm312_vm0, %v411_v62 }
 0x1b9   : > { %v475_v63 = vpop.permute.xlu0 %474  ;;  %v413_v1 = vpop.permute.xlu1 %412  ;;  %v513_v2 = vld [vmem:[#allocation2 + $0x58] sm:$0xff]  ;;  %v522_v3 = vld [vmem:[#allocation2 + $0xa0] sm:$0xff] }
 0x1ba   : > { %484 = vst.msk [vmem:[#allocation2 + $0xb0] sm:$0xff] %vm312_vm0, %v475_v63  ;;  %423 = vst.msk [vmem:[#allocation2 + $0x28] sm:$0xff] %vm312_vm0, %v413_v1  ;;  %2197 = vmatprep.subr.bf16.mxu1 %v513_v2  ;;  %2315 = vmatprep.subr.bf16.mxu0 %v522_v3 }
 0x1bb   : > { %2198 = vmatpush3.bf16.msra.mxu1 %v505_v4  ;;  %2316 = vmatpush3.bf16.msra.mxu0 %v522_v3 }
 0x1bc   : > { %2199 = vmatprep.subr.bf16.mxu1 %v514_v5 }
 0x1bd   : > { %v415_v6 = vpop.permute.xlu1 %414  ;;  %v506_v7 = vld [vmem:[#allocation2 + $0x20] sm:$0xff]  ;;  %v509_v16 = vld [vmem:[#allocation2 + $0x38] sm:$0xff] }
 0x1be   : > { %424 = vst.msk [vmem:[#allocation2 + $0x30] sm:$0xff] %vm312_vm0, %v415_v6 }
 0x1bf   : > { %2200 = vmatpush3.bf16.msra.mxu1 %v506_v7 }
 0x1c0   : > { %2201 = vmatprep.subr.bf16.mxu1 %v515_v8 }
 0x1c1   : > { %v449_v9 = vpop.permute.xlu1 %448  ;;  %v507_v10 = vld [vmem:[#allocation2 + $0x28] sm:$0xff]  ;;  %v524_v20 = vld [vmem:[#allocation2 + $0xb0] sm:$0xff] }
 0x1c2   : > { %457 = vst.msk [vmem:[#allocation2 + $0x78] sm:$0xff] %vm312_vm0, %v449_v9 }
 0x1c3   : > { %2202 = vmatpush3.bf16.msra.mxu1 %v507_v10 }
 0x1c4   : > { %2203 = vmatprep.subr.bf16.mxu1 %v516_v11 }
 0x1c5   : > { %v473_v12 = vpop.permute.xlu1 %472  ;;  %v508_v13 = vld [vmem:[#allocation2 + $0x30] sm:$0xff] }
 0x1c6   : > { %483 = vst.msk [vmem:[#allocation2 + $0xa8] sm:$0xff] %vm312_vm0, %v473_v12 }
 0x1c7   : > { %2204 = vmatpush3.bf16.msra.mxu1 %v508_v13 }
 0x1c9   : > { %v477_v14 = vpop.permute.xlu1 %476  ;;  %v517_v15 = vld [vmem:[#allocation2 + $0x78] sm:$0xff] }
 0x1ca   : > { %485 = vst.msk [vmem:[#allocation2 + $0xb8] sm:$0xff] %vm312_vm0, %v477_v14  ;;  %2205 = vmatprep.subr.bf16.mxu1 %v517_v15 }
 0x1cb   : > { %2206 = vmatpush3.bf16.msra.mxu1 %v509_v16 }
 0x1cd   : > { %v523_v19 = vld [vmem:[#allocation2 + $0xa8] sm:$0xff] }
 0x1ce   : > { %2317 = vmatprep.subr.bf16.mxu0 %v523_v19  ;;  %623 = vmatmul.mubr.bf16.vlgmr.msra.gmra.mrb[0].mxu1 %v2423_v17 }
 0x1cf   : > { %2318 = vmatpush3.bf16.msra.mxu0 %v523_v19  ;;  %630 = vmatprep.mubr.bf16.mxu1 %v2426_v18 }
 0x1d0   : > { %2319 = vmatprep.subr.bf16.mxu0 %v524_v20 }
 0x1d1   : > { %v525_v22 = vld [vmem:[#allocation2 + $0xb8] sm:$0xff] }
 0x1d3   : > { %2320 = vmatpush3.bf16.msra.mxu0 %v524_v20 }
 0x1d4   : > { %2321 = vmatprep.subr.bf16.mxu0 %v525_v22 }
 0x1d6   : > { %631 = vmatmul.mubr.bf16.gmra.mrb[4].mxu1 %v2428_v21 }
 0x1d7   : > { %2322 = vmatpush3.bf16.msra.mxu0 %v525_v22  ;;  %638 = vmatprep.mubr.bf16.mxu1 %v2431_v23 }
 0x1da   : > { %2324 = vmatmul.mubr.bf16.vlgmr.msra.gmra.mrb[16].mxu0 %v2430_v24 }
 0x1db   : > { %2327 = vmatprep.mubr.bf16.mxu0 %v2437_v25 }
 0x1de   : > { %639 = vmatmul.mubr.bf16.gmra.mrb[8].mxu1 %v2433_v26 }
 0x1df   : > { %646 = vmatprep.mubr.bf16.mxu1 %v2434_v27 }
 0x1e2   : > { %2328 = vmatmul.mubr.bf16.gmra.mrb[20].mxu0 %v2438_v28 }
 0x1e6   : > { %647 = vmatmul.mubr.bf16.gmra.mrb[12].mxu1 %v2436_v29 }
 0x1e7   : > { %1223 = vmatprep.mubr.bf16.mxu1 %v2623_v0 }
 0x2a1   : > { %v2207_v30 = vpop.f32.mrb[0].mxu1 }
 0x2a2   : > { %v2208_v31 = vpop.f32.mrb[1].mxu1 }
 0x2a3   : > { %v2209_v32 = vadd.f32 %v2208_v31, %v2207_v30  ;;  %v2210_v33 = vpop.f32.mrb[2].mxu1  ;;  %v2439_v31 = vld [vmem:[#allocation5] sm:$0xff]  }
 0x2a4   : > { %v2211_v34 = vpop.f32.mrb[3].mxu1  ;;  %2331 = vmatprep.subr.bf16.mxu0 %v2439_v31 }
 0x2a5   : > { %v2212_v35 = vadd.f32 %v2211_v34, %v2210_v33  ;;  %2332 = vmatpush3.bf16.msra.mxu0 %v2439_v31 }
 0x2a9   : > { %v2213_v36 = vpop.f32.mrb[4].mxu1 }
 0x2aa   : > { %v2214_v37 = vpop.f32.mrb[5].mxu1 }
 0x2ab   : > { %v2215_v38 = vadd.f32 %v2214_v37, %v2213_v36  ;;  %v2216_v39 = vpop.f32.mrb[6].mxu1 }
 0x2ac   : > { %v2217_v40 = vpop.f32.mrb[7].mxu1 }
 0x2ad   : > { %v2218_v41 = vadd.f32 %v2217_v40, %v2216_v39  ;;  %v2325_v42 = vpop.f32.mrb[16].mxu0 }
 0x2ae   : > { %v2826_v43 = vadd.f32 %v2325_v42, %v2215_v38  ;;  %v689_v44 = vpop.f32.mrb[17].mxu0 }
 0x2af   : > { %v2828_v45 = vadd.f32 %v2209_v32, %v689_v44  ;;  %v2326_v46 = vpop.f32.mrb[18].mxu0  ;;  %v2440_v32 = vld [vmem:[#allocation5 + $0x8] sm:$0xff]  }
 0x2b0   : > { %v2830_v47 = vadd.f32 %v2326_v46, %v2218_v41  ;;  %v692_v48 = vpop.f32.mrb[19].mxu0  ;;  %v757_v2 = vmul.f32 %v2826_v43, %v2826_v43  ;;  %v728_v6 = vsel %vm312_vm0, %v2826_v43, 0.0  ;;  %2333 = vmatprep.subr.bf16.mxu0 %v2440_v32 }
 0x2b1   : > { %v2832_v49 = vadd.f32 %v2212_v35, %v692_v48  ;;  %v722_v50 = vsel %vm312_vm0, %v2828_v45, 0.0  ;;  %v2219_v51 = vpop.f32.mrb[8].mxu1  ;;  %v755_v57 = vmul.f32 %v2828_v45, %v2828_v45  ;;  %2334 = vmatpush3.bf16.msra.mxu0 %v2440_v32 }
 0x2b2   : > { %723 = vadd.xlane.f32.xlu0 %v722_v50  ;;  %v2220_v52 = vpop.f32.mrb[9].mxu1  ;;  %v769_v11 = vsel %vm312_vm0, %v757_v2, 0.0  ;;  %v731_v13 = vsel %vm312_vm0, %v2830_v47, 0.0  ;;  %v758_v14 = vmul.f32 %v2830_v47, %v2830_v47 }
 0x2b3   : > { %v725_v53 = vsel %vm312_vm0, %v2832_v49, 0.0  ;;  %v756_v54 = vmul.f32 %v2832_v49, %v2832_v49  ;;  %v2221_v55 = vadd.f32 %v2220_v52, %v2219_v51  ;;  %v2222_v56 = vpop.f32.mrb[10].mxu1  ;;  %v763_v63 = vsel %vm312_vm0, %v755_v57, 0.0 }
 0x2b4   : > { %726 = vadd.xlane.f32.xlu1 %v725_v53  ;;  %v2223_v58 = vpop.f32.mrb[11].mxu1  ;;  %v772_v20 = vsel %vm312_vm0, %v758_v14, 0.0 }
 0x2b5   : > { %v766_v59 = vsel %vm312_vm0, %v756_v54, 0.0  ;;  %v2224_v60 = vadd.f32 %v2223_v58, %v2222_v56  ;;  %v2329_v61 = vpop.f32.mrb[20].mxu0 }
 0x2b6   : > { %767 = vadd.xlane.f32.xlu0 %v766_v59  ;;  %v705_v62 = vpop.f32.mrb[21].mxu0 }
 0x2b7   : > { %v2844_v1 = vadd.f32 %v2221_v55, %v705_v62  ;;  %v2330_v3 = vpop.f32.mrb[22].mxu0 }
 0x2b8   : > { %764 = vadd.xlane.f32.xlu1 %v763_v63  ;;  %v708_v4 = vpop.f32.mrb[23].mxu0 }
 0x2b9   : > { %v2225_v5 = vpop.f32.mrb[12].mxu1  ;;  %v2850_v7 = vadd.f32 %v2224_v60, %v708_v4  ;;  %v734_v17 = vsel %vm312_vm0, %v2844_v1, 0.0  ;;  %v759_v18 = vmul.f32 %v2844_v1, %v2844_v1 }
 0x2ba   : > { %729 = vadd.xlane.f32.xlu0 %v728_v6  ;;  %v2226_v8 = vpop.f32.mrb[13].mxu1 }
 0x2bb   : > { %v2227_v9 = vadd.f32 %v2226_v8, %v2225_v5  ;;  %v2228_v10 = vpop.f32.mrb[14].mxu1  ;;  %v775_v21 = vsel %vm312_vm0, %v759_v18, 0.0  ;;  %v737_v22 = vsel %vm312_vm0, %v2850_v7, 0.0  ;;  %v760_v23 = vmul.f32 %v2850_v7, %v2850_v7 }
 0x2bc   : > { %770 = vadd.xlane.f32.xlu1 %v769_v11  ;;  %v2229_v12 = vpop.f32.mrb[15].mxu1 }
 0x2bd   : > { %v2857_v15 = vadd.f32 %v2329_v61, %v2227_v9  ;;  %v2230_v16 = vadd.f32 %v2229_v12, %v2228_v10  ;;  %v778_v26 = vsel %vm312_vm0, %v760_v23, 0.0 }
 0x2be   : > { %732 = vadd.xlane.f32.xlu0 %v731_v13 }
 0x2bf   : > { %v2863_v19 = vadd.f32 %v2330_v3, %v2230_v16  ;;  %v740_v24 = vsel %vm312_vm0, %v2857_v15, 0.0  ;;  %v761_v25 = vmul.f32 %v2857_v15, %v2857_v15 }
 0x2c0   : > { %735 = vadd.xlane.f32.xlu1 %v734_v17 }
 0x2c1   : > { %v781_v27 = vsel %vm312_vm0, %v761_v25, 0.0  ;;  %v743_v28 = vsel %vm312_vm0, %v2863_v19, 0.0  ;;  %v762_v29 = vmul.f32 %v2863_v19, %v2863_v19 }
 0x2c2   : > { %773 = vadd.xlane.f32.xlu0 %v772_v20  ;;  %v2896_v20 = vld [vmem:[%s3399_s4] ss:$0 sm:$0xff] }
 0x2c3   : > { %v784_v30 = vsel %vm312_vm0, %v762_v29, 0.0 }
 0x2c4   : > { %776 = vadd.xlane.f32.xlu1 %v775_v21 }
 0x2c6   : > { %738 = vadd.xlane.f32.xlu0 %v737_v22 }
 0x2c8   : > { %741 = vadd.xlane.f32.xlu1 %v740_v24 }
 0x2ca   : > { %779 = vadd.xlane.f32.xlu0 %v778_v26 }
 0x2cc   : > { %782 = vadd.xlane.f32.xlu1 %v781_v27 }
 0x2ce   : > { %744 = vadd.xlane.f32.xlu0 %v743_v28 }
 0x2d2   : > { %785 = vadd.xlane.f32.xlu0 %v784_v30 }
 0x33f   : > { %v724_v33 = vpop.xlane.xlu0 %723 }
 0x340   : > { %v747_v35 = vmul.f32 0.03125, %v724_v33 }
 0x341   : > { %v727_v34 = vpop.xlane.xlu1 %726 }
 0x342   : > { %v748_v36 = vmul.f32 0.03125, %v727_v34  ;;  %v795_v41 = vmul.f32 %v747_v35, %v747_v35  ;;  %v819_v23 = vsub.f32 %v2828_v45, %v747_v35 }
 0x343   : > { %v768_v37 = vpop.xlane.xlu0 %767 }
 0x344   : > { %v796_v38 = vmul.f32 %v748_v36, %v748_v36  ;;  %v788_v39 = vmul.f32 0.03125, %v768_v37  ;;  %v820_v16 = vsub.f32 %v2832_v49, %v748_v36  ;;  %v2904_v49 = vld [vmem:[%s3399_s4 + $0x1] ss:$0 sm:$0xff] }
 0x345   : > { %v765_v40 = vpop.xlane.xlu1 %764 }
 0x346   : > { %v804_v42 = vsub.f32 %v788_v39, %v796_v38  ;;  %v787_v44 = vmul.f32 0.03125, %v765_v40 }
 0x347   : > { %v730_v46 = vpop.xlane.xlu0 %729 }
 0x348   : > { %v812_v48 = vmax.f32 %v804_v42, 0.0  ;;  %v803_v50 = vsub.f32 %v787_v44, %v795_v41  ;;  %v749_v51 = vmul.f32 0.03125, %v730_v46 }
 0x349   : > { %v771_v52 = vpop.xlane.xlu1 %770 }
 0x34a   : > { %v828_v53 = vadd.f32 1e-05, %v812_v48  ;;  %v811_v54 = vmax.f32 %v803_v50, 0.0  ;;  %v797_v55 = vmul.f32 %v749_v51, %v749_v51  ;;  %v789_v56 = vmul.f32 0.03125, %v771_v52 }
 0x34b   : > { %v733_v57 = vpop.xlane.xlu0 %732  ;;  %v821_v39 = vsub.f32 %v2826_v43, %v749_v51 }
 0x34c   : > { %2465 = vrsqrt.f32 %v828_v53  ;;  %v827_v58 = vadd.f32 1e-05, %v811_v54  ;;  %v2882_v59 = vmul.f32 0.03125, %v733_v57  ;;  %v805_v60 = vsub.f32 %v789_v56, %v797_v55 }
 0x34d   : > { %v736_v61 = vpop.xlane.xlu1 %735 }
 0x34e   : > { %2467 = vrsqrt.f32 %v827_v58  ;;  %v2884_v62 = vmul.f32 0.03125, %v736_v61  ;;  %v813_v63 = vmax.f32 %v805_v60, 0.0  ;;  %v798_v3 = vmul.f32 %v2882_v59, %v2882_v59 }
 0x34f   : > { %v774_v2 = vpop.xlane.xlu0 %773  ;;  %v822_v43 = vsub.f32 %v2830_v47, %v2882_v59 }
 0x350   : > { %v799_v4 = vmul.f32 %v2884_v62, %v2884_v62  ;;  %v790_v5 = vmul.f32 0.03125, %v774_v2  ;;  %v829_v6 = vadd.f32 1e-05, %v813_v63  ;;  %v823_v2 = vsub.f32 %v2844_v1, %v2884_v62 }
 0x351   : > { %v777_v8 = vpop.xlane.xlu1 %776 }
 0x352   : > { %v806_v9 = vsub.f32 %v790_v5, %v798_v3  ;;  %v791_v10 = vmul.f32 0.03125, %v777_v8  ;;  %2469 = vrsqrt.f32 %v829_v6 }
 0x353   : > { %v739_v11 = vpop.xlane.xlu0 %738 }
 0x354   : > { %v814_v12 = vmax.f32 %v806_v9, 0.0  ;;  %v807_v13 = vsub.f32 %v791_v10, %v799_v4  ;;  %v2890_v14 = vmul.f32 0.03125, %v739_v11 }
 0x355   : > { %v742_v17 = vpop.xlane.xlu1 %741 }
 0x356   : > { %v2466_v18 = vpop.eup %2465  ;;  %v830_v21 = vadd.f32 1e-05, %v814_v12  ;;  %v815_v22 = vmax.f32 %v807_v13, 0.0  ;;  %v2899_v24 = vmul.f32 0.03125, %v742_v17  ;;  %v800_v29 = vmul.f32 %v2890_v14, %v2890_v14 }
 0x357   : > { %v780_v25 = vpop.xlane.xlu0 %779  ;;  %v844_v26 = vmul.f32 %v2466_v18, %v820_v16  ;;  %v824_v59 = vsub.f32 %v2850_v7, %v2890_v14 }
 0x358   : > { %v2468_v27 = vpop.eup %2467  ;;  %2471 = vrsqrt.f32 %v830_v21  ;;  %v831_v28 = vadd.f32 1e-05, %v815_v22  ;;  %v792_v30 = vmul.f32 0.03125, %v780_v25  ;;  %v801_v33 = vmul.f32 %v2899_v24, %v2899_v24 }
 0x359   : > { %v783_v31 = vpop.xlane.xlu1 %782  ;;  %v843_v32 = vmul.f32 %v2468_v27, %v819_v23  ;;  %v856_v45 = vmul.f32 %v2896_v20, %v844_v26  ;;  %v825_v13 = vsub.f32 %v2857_v15, %v2899_v24 }
 0x35a   : > { %2473 = vrsqrt.f32 %v831_v28  ;;  %v808_v34 = vsub.f32 %v792_v30, %v800_v29  ;;  %v793_v35 = vmul.f32 0.03125, %v783_v31 }
 0x35b   : > { %v745_v36 = vpop.xlane.xlu0 %744  ;;  %v855_v37 = vmul.f32 %v2896_v20, %v843_v32  ;;  %v868_v38 = vadd.f32 %v2904_v49, %v856_v45 }
 0x35c   : > { %v816_v40 = vmax.f32 %v808_v34, 0.0  ;;  %v809_v41 = vsub.f32 %v793_v35, %v801_v33  ;;  %v754_v42 = vmul.f32 0.03125, %v745_v36  ;;  %v2470_v44 = vpop.eup %2469 }
 0x35d   : > { %v867_v46 = vadd.f32 %v2904_v49, %v855_v37  ;;  %v845_v48 = vmul.f32 %v2470_v44, %v821_v39  ;;  %v876_v55 = vmax.f32 %v868_v38, 0.0 }
 0x35e   : > { %v832_v50 = vadd.f32 1e-05, %v816_v40  ;;  %v817_v52 = vmax.f32 %v809_v41, 0.0  ;;  %v802_v57 = vmul.f32 %v754_v42, %v754_v42  ;;  %v826_v14 = vsub.f32 %v2863_v19, %v754_v42 }
 0x35f   : > { %v786_v53 = vpop.xlane.xlu0 %785  ;;  %v875_v54 = vmax.f32 %v867_v46, 0.0  ;;  %v857_v60 = vmul.f32 %v2896_v20, %v845_v48 }
 0x360   : > { %2475 = vrsqrt.f32 %v832_v50  ;;  %v833_v56 = vadd.f32 1e-05, %v817_v52  ;;  %v794_v58 = vmul.f32 0.03125, %v786_v53 }
 0x361   : > { %v883_v51 = vpack.c.bf16 %v876_v55, %v875_v54  ;;  %v869_v6 = vadd.f32 %v2904_v49, %v857_v60 }
 0x362   : > { %v2472_v61 = vpop.eup %2471  ;;  %2477 = vrsqrt.f32 %v833_v56  ;;  %v810_v63 = vsub.f32 %v794_v58, %v802_v57 }
 0x363   : > { %v846_v3 = vmul.f32 %v2472_v61, %v822_v43  ;;  %2335 = vmatprep.mubr.msk.bf16.mxu0 %vm312_vm0, %v883_v51  ;;  %v877_v11 = vmax.f32 %v869_v6, 0.0  ;;  %v2441_v6 = vld [vmem:[#allocation3 + $0x20] ss:$8 sps:$4 sm:$0xff]  }
 0x364   : > { %v2474_v4 = vpop.eup %2473  ;;  %v818_v5 = vmax.f32 %v810_v63, 0.0 }
 0x365   : > { %v858_v8 = vmul.f32 %v2896_v20, %v846_v3  ;;  %v847_v9 = vmul.f32 %v2474_v4, %v823_v2 }
 0x366   : > { %v834_v10 = vadd.f32 1e-05, %v818_v5 }
 0x367   : > { %v870_v47 = vadd.f32 %v2904_v49, %v858_v8  ;;  %v859_v1 = vmul.f32 %v2896_v20, %v847_v9  ;;  %v2443_v8 = vld [vmem:[#allocation3 + $0x24] ss:$8 sps:$4 sm:$0xff]   ;;  %v2446_v9 = vld [vmem:[#allocation3 + $0x34] ss:$8 sps:$4 sm:$0xff]  }
 0x368   : > { %2479 = vrsqrt.f32 %v834_v10  ;;  %1191 = vmatprep.subr.bf16.mxu1 %v2443_v8  ;;  %v2444_v10 = vld [vmem:[#allocation3 + $0x30] ss:$8 sps:$4 sm:$0xff]  }
 0x369   : > { %v878_v12 = vmax.f32 %v870_v47, 0.0  ;;  %v871_v22 = vadd.f32 %v2904_v49, %v859_v1  ;;  %1192 = vmatpush1.bf16.msra.mxu1 %v2441_v6 }
 0x36a   : > { %v2476_v62 = vpop.eup %2475  ;;  %1193 = vmatprep.subr.bf16.mxu1 %v2446_v9 }
 0x36b   : > { %v884_v16 = vpack.c.bf16 %v878_v12, %v877_v11  ;;  %v848_v17 = vmul.f32 %v2476_v62, %v824_v59  ;;  %v879_v25 = vmax.f32 %v871_v22, 0.0 }
 0x36c   : > { %v2478_v18 = vpop.eup %2477 }
 0x36d   : > { %2336 = vmatmul.mubr.msk.bf16.vlgmr.msra.gmra.mrb[24].mxu0 %vm312_vm0, %v884_v16  ;;  %v860_v21 = vmul.f32 %v2896_v20, %v848_v17  ;;  %v849_v23 = vmul.f32 %v2478_v18, %v825_v13  ;;  %1194 = vmatpush1.bf16.msra.mxu1 %v2444_v10 }
 0x36f   : > { %v872_v7 = vadd.f32 %v2904_v49, %v860_v21  ;;  %v861_v27 = vmul.f32 %v2896_v20, %v849_v23 }
 0x371   : > { %v880_v26 = vmax.f32 %v872_v7, 0.0  ;;  %v873_v30 = vadd.f32 %v2904_v49, %v861_v27 }
 0x372   : > { %v2480_v28 = vpop.eup %2479 }
 0x373   : > { %v885_v15 = vpack.c.bf16 %v880_v26, %v879_v25  ;;  %v850_v24 = vmul.f32 %v2480_v28, %v826_v14  ;;  %v881_v32 = vmax.f32 %v873_v30, 0.0 }
 0x375   : > { %2339 = vmatprep.mubr.msk.bf16.mxu0 %vm312_vm0, %v885_v15  ;;  %v862_v29 = vmul.f32 %v2896_v20, %v850_v24 }
 0x377   : > { %v874_v31 = vadd.f32 %v2904_v49, %v862_v29 }
 0x379   : > { %v882_v45 = vmax.f32 %v874_v31, 0.0 }
 0x37b   : > { %v886_v33 = vpack.c.bf16 %v882_v45, %v881_v32 }
 0x37d   : > { %2340 = vmatmul.mubr.msk.bf16.gmra.mrb[28].mxu0 %vm312_vm0, %v886_v33 }
 0x440   : > { %v2940_v19 = vpop.f32.mrb[24].mxu0 }
 0x441   : > { %v2942_v34 = vpop.f32.mrb[25].mxu0  ;;  %v988_v41 = vsel %vm312_vm0, %v2940_v19, 0.0  ;;  %v1016_v42 = vmul.f32 %v2940_v19, %v2940_v19 }
 0x442   : > { %v2944_v35 = vpop.f32.mrb[26].mxu0  ;;  %v982_v36 = vsel %vm312_vm0, %v2942_v34, 0.0  ;;  %v1014_v20 = vmul.f32 %v2942_v34, %v2942_v34 }
 0x443   : > { %983 = vadd.xlane.f32.xlu1 %v982_v36  ;;  %v2950_v37 = vpop.f32.mrb[27].mxu0  ;;  %v991_v44 = vsel %vm312_vm0, %v2944_v35, 0.0  ;;  %v1017_v46 = vmul.f32 %v2944_v35, %v2944_v35  ;;  %v1028_v48 = vsel %vm312_vm0, %v1016_v42, 0.0 }
 0x444   : > { %v985_v49 = vsel %vm312_vm0, %v2950_v37, 0.0  ;;  %v1015_v38 = vmul.f32 %v2950_v37, %v2950_v37  ;;  %v1022_v39 = vsel %vm312_vm0, %v1014_v20, 0.0 }
 0x445   : > { %986 = vadd.xlane.f32.xlu0 %v985_v49  ;;  %v1031_v52 = vsel %vm312_vm0, %v1017_v46, 0.0 }
 0x446   : > { %v1025_v40 = vsel %vm312_vm0, %v1015_v38, 0.0 }
 0x447   : > { %1023 = vadd.xlane.f32.xlu1 %v1022_v39 }
 0x449   : > { %1026 = vadd.xlane.f32.xlu0 %v1025_v40 }
 0x44b   : > { %989 = vadd.xlane.f32.xlu1 %v988_v41 }
 0x44d   : > { %992 = vadd.xlane.f32.xlu0 %v991_v44 }
 0x44f   : > { %1029 = vadd.xlane.f32.xlu1 %v1028_v48 }
 0x450   : > { %v2967_v50 = vpop.f32.mrb[28].mxu0 }
 0x451   : > { %1032 = vadd.xlane.f32.xlu0 %v1031_v52  ;;  %v2970_v53 = vpop.f32.mrb[29].mxu0  ;;  %v1000_v61 = vsel %vm312_vm0, %v2967_v50, 0.0  ;;  %v1020_v63 = vmul.f32 %v2967_v50, %v2967_v50 }
 0x452   : > { %v2972_v54 = vpop.f32.mrb[30].mxu0  ;;  %v994_v55 = vsel %vm312_vm0, %v2970_v53, 0.0  ;;  %v1018_v56 = vmul.f32 %v2970_v53, %v2970_v53 }
 0x453   : > { %995 = vadd.xlane.f32.xlu1 %v994_v55  ;;  %v2978_v57 = vpop.f32.mrb[31].mxu0  ;;  %v1003_v2 = vsel %vm312_vm0, %v2972_v54, 0.0  ;;  %v1021_v3 = vmul.f32 %v2972_v54, %v2972_v54  ;;  %v1040_v4 = vsel %vm312_vm0, %v1020_v63, 0.0 }
 0x454   : > { %v997_v58 = vsel %vm312_vm0, %v2978_v57, 0.0  ;;  %v1019_v60 = vmul.f32 %v2978_v57, %v2978_v57  ;;  %v1034_v43 = vsel %vm312_vm0, %v1018_v56, 0.0 }
 0x455   : > { %998 = vadd.xlane.f32.xlu0 %v997_v58  ;;  %v1043_v5 = vsel %vm312_vm0, %v1021_v3, 0.0 }
 0x456   : > { %v1037_v51 = vsel %vm312_vm0, %v1019_v60, 0.0  ;;  %v3014_v60 = vld [vmem:[%s3399_s4 + $0x2] ss:$0 sm:$0xff] }
 0x457   : > { %1035 = vadd.xlane.f32.xlu1 %v1034_v43 }
 0x459   : > { %1038 = vadd.xlane.f32.xlu0 %v1037_v51 }
 0x45b   : > { %1001 = vadd.xlane.f32.xlu1 %v1000_v61 }
 0x45d   : > { %1004 = vadd.xlane.f32.xlu0 %v1003_v2 }
 0x45f   : > { %1041 = vadd.xlane.f32.xlu1 %v1040_v4 }
 0x461   : > { %1044 = vadd.xlane.f32.xlu0 %v1043_v5 }
 0x4d0   : > { %v984_v47 = vpop.xlane.xlu1 %983 }
 0x4d1   : > { %v1006_v59 = vmul.f32 0.03125, %v984_v47 }
 0x4d2   : > { %v987_v11 = vpop.xlane.xlu0 %986 }
 0x4d3   : > { %v1007_v12 = vmul.f32 0.03125, %v987_v11  ;;  %v1054_v62 = vmul.f32 %v1006_v59, %v1006_v59  ;;  %v1078_v55 = vsub.f32 %v2942_v34, %v1006_v59  ;;  %v3022_v34 = vld [vmem:[%s3399_s4 + $0x3] ss:$0 sm:$0xff] }
 0x4d4   : > { %v1024_v1 = vpop.xlane.xlu1 %1023 }
 0x4d5   : > { %v1046_v13 = vmul.f32 0.03125, %v1024_v1  ;;  %v1055_v17 = vmul.f32 %v1007_v12, %v1007_v12  ;;  %v1079_v63 = vsub.f32 %v2950_v37, %v1007_v12 }
 0x4d6   : > { %v1027_v16 = vpop.xlane.xlu0 %1026 }
 0x4d7   : > { %v1062_v18 = vsub.f32 %v1046_v13, %v1054_v62  ;;  %v1047_v21 = vmul.f32 0.03125, %v1027_v16 }
 0x4d8   : > { %v990_v22 = vpop.xlane.xlu1 %989 }
 0x4d9   : > { %v1070_v23 = vmax.f32 %v1062_v18, 0.0  ;;  %v1063_v7 = vsub.f32 %v1047_v21, %v1055_v17  ;;  %v2996_v14 = vmul.f32 0.03125, %v990_v22 }
 0x4da   : > { %v993_v25 = vpop.xlane.xlu0 %992 }
 0x4db   : > { %v1086_v26 = vadd.f32 1e-05, %v1070_v23  ;;  %v1071_v27 = vmax.f32 %v1063_v7, 0.0  ;;  %v2998_v28 = vmul.f32 0.03125, %v993_v25  ;;  %v1056_v29 = vmul.f32 %v2996_v14, %v2996_v14  ;;  %v2529_v23 = vld [vmem:[%s2750_s30] sm:$0xff] }
 0x4dc   : > { %v1030_v15 = vpop.xlane.xlu1 %1029  ;;  %v1080_v21 = vsub.f32 %v2940_v19, %v2996_v14 }
 0x4dd   : > { %2481 = vrsqrt.f32 %v1086_v26  ;;  %v1087_v24 = vadd.f32 1e-05, %v1071_v27  ;;  %v1048_v30 = vmul.f32 0.03125, %v1030_v15  ;;  %v1057_v32 = vmul.f32 %v2998_v28, %v2998_v28 }
 0x4de   : > { %v1033_v31 = vpop.xlane.xlu0 %1032 }
 0x4df   : > { %2483 = vrsqrt.f32 %v1087_v24  ;;  %v1064_v45 = vsub.f32 %v1048_v30, %v1056_v29  ;;  %v1049_v33 = vmul.f32 0.03125, %v1033_v31  ;;  %v1081_v24 = vsub.f32 %v2944_v35, %v2998_v28  ;;  %v2530_v30 = vld [vmem:[%s2750_s30 + $0x8] sm:$0xff] }
 0x4e0   : > { %v996_v36 = vpop.xlane.xlu1 %995 }
 0x4e1   : > { %v1072_v20 = vmax.f32 %v1064_v45, 0.0  ;;  %v1065_v49 = vsub.f32 %v1049_v33, %v1057_v32  ;;  %v3004_v38 = vmul.f32 0.03125, %v996_v36 }
 0x4e2   : > { %v999_v39 = vpop.xlane.xlu0 %998 }
 0x4e3   : > { %v1088_v40 = vadd.f32 1e-05, %v1072_v20  ;;  %v1073_v41 = vmax.f32 %v1065_v49, 0.0  ;;  %v3006_v42 = vmul.f32 0.03125, %v999_v39  ;;  %v1058_v48 = vmul.f32 %v3004_v38, %v3004_v38 }
 0x4e4   : > { %v1036_v44 = vpop.xlane.xlu1 %1035 }
 0x4e5   : > { %2485 = vrsqrt.f32 %v1088_v40  ;;  %v1089_v46 = vadd.f32 1e-05, %v1073_v41  ;;  %v1050_v52 = vmul.f32 0.03125, %v1036_v44  ;;  %v1059_v43 = vmul.f32 %v3006_v42, %v3006_v42 }
 0x4e6   : > { %v1039_v56 = vpop.xlane.xlu0 %1038  ;;  %v1082_v44 = vsub.f32 %v2970_v53, %v3004_v38 }
 0x4e7   : > { %v2482_v58 = vpop.eup %2481  ;;  %2487 = vrsqrt.f32 %v1089_v46  ;;  %v1066_v51 = vsub.f32 %v1050_v52, %v1058_v48  ;;  %v1051_v61 = vmul.f32 0.03125, %v1039_v56  ;;  %v2531_v48 = vld [vmem:[%s2750_s30 + $0x10] sm:$0xff]  ;;  %v1083_v56 = vsub.f32 %v2978_v57, %v3006_v42  ;;  %v2533_v42 = vld [vmem:[%s2750_s30 + $0x20] sm:$0xff] }
 0x4e8   : > { %v1102_v2 = vmul.f32 %v2482_v58, %v1078_v55  ;;  %v1002_v3 = vpop.xlane.xlu1 %1001 }
 0x4e9   : > { %v2484_v4 = vpop.eup %2483  ;;  %v1074_v5 = vmax.f32 %v1066_v51, 0.0  ;;  %v1067_v6 = vsub.f32 %v1051_v61, %v1059_v43  ;;  %v3024_v8 = vmul.f32 0.03125, %v1002_v3  ;;  %v2532_v43 = vld [vmem:[%s2750_s30 + $0x18] sm:$0xff] }
 0x4ea   : > { %v1114_v9 = vmul.f32 %v3014_v60, %v1102_v2  ;;  %v1103_v10 = vmul.f32 %v2484_v4, %v1079_v63  ;;  %v1005_v47 = vpop.xlane.xlu0 %1004 }
 0x4eb   : > { %v1090_v59 = vadd.f32 1e-05, %v1074_v5  ;;  %v1075_v11 = vmax.f32 %v1067_v6, 0.0  ;;  %v3029_v1 = vmul.f32 0.03125, %v1005_v47  ;;  %v1060_v16 = vmul.f32 %v3024_v8, %v3024_v8 }
 0x4ec   : > { %v1126_v37 = vadd.f32 %v3022_v34, %v1114_v9  ;;  %v1115_v12 = vmul.f32 %v3014_v60, %v1103_v10  ;;  %v1042_v62 = vpop.xlane.xlu1 %1041  ;;  %v1084_v6 = vsub.f32 %v2967_v50, %v3024_v8 }
 0x4ed   : > { %2489 = vrsqrt.f32 %v1090_v59  ;;  %v1091_v13 = vadd.f32 1e-05, %v1075_v11  ;;  %v1052_v17 = vmul.f32 0.03125, %v1042_v62  ;;  %v1061_v26 = vmul.f32 %v3029_v1, %v3029_v1  ;;  %v2534_v11 = vld [vmem:[%s2750_s30 + $0x28] sm:$0xff] }
 0x4ee   : > { %v1127_v18 = vadd.f32 %v3022_v34, %v1115_v12  ;;  %v1045_v22 = vpop.xlane.xlu0 %1044  ;;  %v1134_v7 = vadd.f32 %v2529_v23, %v1126_v37  ;;  %v1085_v47 = vsub.f32 %v2972_v54, %v3029_v1  ;;  %v2535_v54 = vld [vmem:[%s2750_s30 + $0x30] sm:$0xff] }
 0x4ef   : > { %v2486_v25 = vpop.eup %2485  ;;  %2491 = vrsqrt.f32 %v1091_v13  ;;  %v1068_v27 = vsub.f32 %v1052_v17, %v1060_v16  ;;  %v1053_v15 = vmul.f32 0.03125, %v1045_v22  ;;  %v2536_v22 = vld [vmem:[%s2750_s30 + $0x38] sm:$0xff] }
 0x4f0   : > { %v1104_v29 = vmul.f32 %v2486_v25, %v1080_v21  ;;  %v1135_v31 = vadd.f32 %v2530_v30, %v1127_v18  ;;  %v1142_v33 = vmax.f32 %v1134_v7, 0.0 }
 0x4f1   : > { %v2488_v32 = vpop.eup %2487  ;;  %v1076_v45 = vmax.f32 %v1068_v27, 0.0  ;;  %v1069_v19 = vsub.f32 %v1053_v15, %v1061_v26 }
 0x4f2   : > { %v1105_v14 = vmul.f32 %v2488_v32, %v1081_v24  ;;  %v1143_v36 = vmax.f32 %v1135_v31, 0.0  ;;  %v1116_v20 = vmul.f32 %v3014_v60, %v1104_v29 }
 0x4f3   : > { %v1092_v49 = vadd.f32 1e-05, %v1076_v45  ;;  %v1077_v39 = vmax.f32 %v1069_v19, 0.0 }
 0x4f4   : > { %v1150_v40 = vpack.c.bf16 %v1143_v36, %v1142_v33  ;;  %v1117_v41 = vmul.f32 %v3014_v60, %v1105_v14  ;;  %v1128_v35 = vadd.f32 %v3022_v34, %v1116_v20 }
 0x4f5   : > { %2493 = vrsqrt.f32 %v1092_v49  ;;  %v1093_v28 = vadd.f32 1e-05, %v1077_v39 }
 0x4f6   : > { %2161 = vmatmul.mubr.msk.bf16.vlgmr.msra.gmra.mrb[16].mxu1 %vm312_vm0, %v1150_v40  ;;  %v1129_v46 = vadd.f32 %v3022_v34, %v1117_v41  ;;  %v1136_v52 = vadd.f32 %v2531_v48, %v1128_v35 }
 0x4f7   : > { %v2490_v55 = vpop.eup %2489  ;;  %2495 = vrsqrt.f32 %v1093_v28  ;;  %1233 = vmatprep.mubr.bf16.mxu1 %v2623_v0 }
 0x4f8   : > { %v1106_v58 = vmul.f32 %v2490_v55, %v1082_v44  ;;  %v1137_v51 = vadd.f32 %v2532_v43, %v1129_v46  ;;  %v1144_v53 = vmax.f32 %v1136_v52, 0.0  ;;  %v2453_v43 = vld [vmem:[%s2758_s9 + $0x8] ss:$12 sps:$4 sm:$0xff]  }
 0x4f9   : > { %v2492_v61 = vpop.eup %2491 }
 0x4fa   : > { %v1107_v63 = vmul.f32 %v2492_v61, %v1083_v56  ;;  %v1145_v38 = vmax.f32 %v1137_v51, 0.0  ;;  %v1118_v2 = vmul.f32 %v3014_v60, %v1106_v58  ;;  %v2449_v58 = vld [vmem:[%s2758_s9 + $0x4] ss:$12 sps:$4 sm:$0xff]  }
 0x4fb   : > { %1488 = vmatprep.mubr.bf16.mxu0 %v2449_v58 }
 0x4fc   : > { %v1151_v3 = vpack.c.bf16 %v1145_v38, %v1144_v53  ;;  %v1119_v4 = vmul.f32 %v3014_v60, %v1107_v63  ;;  %v1130_v5 = vadd.f32 %v3022_v34, %v1118_v2 }
 0x4fe   : > { %2162 = vmatmul.mubr.msk.bf16.gmra.mrb[20].mxu1 %vm312_vm0, %v1151_v3  ;;  %v1131_v57 = vadd.f32 %v3022_v34, %v1119_v4  ;;  %v1138_v9 = vadd.f32 %v2533_v42, %v1130_v5 }
 0x4ff   : > { %v2494_v10 = vpop.eup %2493  ;;  %1243 = vmatprep.mubr.bf16.mxu1 %v2623_v0 }
 0x500   : > { %v1108_v59 = vmul.f32 %v2494_v10, %v1084_v6  ;;  %v1139_v37 = vadd.f32 %v2534_v11, %v1131_v57  ;;  %v1146_v50 = vmax.f32 %v1138_v9, 0.0 }
 0x501   : > { %v2496_v12 = vpop.eup %2495 }
 0x502   : > { %v1109_v62 = vmul.f32 %v2496_v12, %v1085_v47  ;;  %v1147_v8 = vmax.f32 %v1139_v37, 0.0  ;;  %v1120_v13 = vmul.f32 %v3014_v60, %v1108_v59 }
 0x504   : > { %v1152_v16 = vpack.c.bf16 %v1147_v8, %v1146_v50  ;;  %v1121_v17 = vmul.f32 %v3014_v60, %v1109_v62  ;;  %v1132_v18 = vadd.f32 %v3022_v34, %v1120_v13 }
 0x506   : > { %2163 = vmatmul.mubr.msk.bf16.gmra.mrb[24].mxu1 %vm312_vm0, %v1152_v16  ;;  %v1133_v21 = vadd.f32 %v3022_v34, %v1121_v17  ;;  %v1140_v1 = vadd.f32 %v2535_v54, %v1132_v18 }
 0x507   : > { %1253 = vmatprep.mubr.bf16.mxu1 %v2623_v0 }
 0x508   : > { %v1141_v23 = vadd.f32 %v2536_v22, %v1133_v21  ;;  %v1148_v7 = vmax.f32 %v1140_v1, 0.0 }
 0x50a   : > { %v1149_v25 = vmax.f32 %v1141_v23, 0.0 }
 0x50c   : > { %v1153_v26 = vpack.c.bf16 %v1149_v25, %v1148_v7 }
 0x50e   : > { %2164 = vmatmul.mubr.msk.bf16.gmra.mrb[28].mxu1 %vm312_vm0, %v1153_v26  ;;  %v2447_v26 = vld [vmem:[%s2758_s9] ss:$12 sps:$4 sm:$0xff]  }
 0x50f   : > { %2359 = vmatprep.mubr.bf16.mxu1 %v2453_v43 }
 0x5c9   : > { %v1225_v27 = vpop.f32.mrb[16].mxu1 }
 0x5ca   : > { %v1227_v15 = vpop.f32.mrb[17].mxu1 }
 0x5cb   : > { %v1229_v60 = vpop.f32.mrb[18].mxu1 }
 0x5cc   : > { %v1264_v24 = vpack.c.bf16 %v1229_v60, %v1225_v27  ;;  %v1231_v29 = vpop.f32.mrb[19].mxu1  ;;  %v2450_v27 = vld [vmem:[%s2758_s9 + $0x1c] ss:$12 sps:$4 sm:$0xff]  }
 0x5cd   : > { %v1324_v30 = vpack.c.bf16 %v1231_v29, %v1227_v15 }
 0x5ce   : > { %1268 = vst.msk [vmem:[#allocation2] sm:$0xff] %vm312_vm0, %v1264_v24  ;;  %1292 = vrot.lane.b32.xlu1 %v1264_v24, %s2624_s10 }
 0x5cf   : > { %1328 = vst.msk [vmem:[#allocation2 + $0x80] sm:$0xff] %vm312_vm0, %v1324_v30 }
 0x5d1   : > { %v1235_v0 = vpop.f32.mrb[20].mxu1 }
 0x5d2   : > { %v1237_v34 = vpop.f32.mrb[21].mxu1 }
 0x5d3   : > { %v1239_v31 = vpop.f32.mrb[22].mxu1 }
 0x5d4   : > { %v1265_v32 = vpack.c.bf16 %v1239_v31, %v1235_v0  ;;  %v1241_v45 = vpop.f32.mrb[23].mxu1  ;;  %v2454_v0 = vld [vmem:[%s2758_s9 + $0x20] ss:$12 sps:$4 sm:$0xff]   ;;  %v2457_v31 = vld [vmem:[%s2758_s9 + $0x30] ss:$12 sps:$4 sm:$0xff]  }
 0x5d5   : > { %v1325_v19 = vpack.c.bf16 %v1241_v45, %v1237_v34  ;;  %v1368_v53 = vld [vmem:[#allocation2] sm:$0xff]  ;;  %v2462_v45 = vld [vmem:[%s2758_s9 + $0x50] ss:$12 sps:$4 sm:$0xff]  }
 0x5d6   : > { %1269 = vst.msk [vmem:[#allocation2 + $0x8] sm:$0xff] %vm312_vm0, %v1265_v32  ;;  %1294 = vrot.lane.b32.xlu0 %v1265_v32, %s2624_s10  ;;  %v1384_v14 = vld [vmem:[#allocation2 + $0x80] sm:$0xff] }
 0x5d7   : > { %1329 = vst.msk [vmem:[#allocation2 + $0x88] sm:$0xff] %vm312_vm0, %v1325_v19  ;;  %2343 = vmatprep.subr.bf16.mxu1 %v1384_v14  ;;  %v2460_v34 = vld [vmem:[%s2758_s9 + $0x38] ss:$12 sps:$4 sm:$0xff]  }
 0x5d8   : > { %2344 = vmatpush3.bf16.msra.mxu1 %v1384_v14 }
 0x5d9   : > { %v1245_v33 = vpop.f32.mrb[24].mxu1 }
 0x5da   : > { %1308 = vrot.lane.b32.xlu0 %v1264_v24, %s2625_s11  ;;  %v1247_v36 = vpop.f32.mrb[25].mxu1 }
 0x5db   : > { %v1249_v20 = vpop.f32.mrb[26].mxu1 }
 0x5dc   : > { %v1266_v49 = vpack.c.bf16 %v1249_v20, %v1245_v33  ;;  %v1251_v39 = vpop.f32.mrb[27].mxu1 }
 0x5dd   : > { %v1326_v40 = vpack.c.bf16 %v1251_v39, %v1247_v36  ;;  %v1369_v5 = vld [vmem:[#allocation2 + $0x8] sm:$0xff] }
 0x5de   : > { %1270 = vst.msk [vmem:[#allocation2 + $0x10] sm:$0xff] %vm312_vm0, %v1266_v49  ;;  %1310 = vrot.lane.b32.xlu0 %v1265_v32, %s2625_s11  ;;  %1296 = vrot.lane.b32.xlu1 %v1266_v49, %s2624_s10  ;;  %v1385_v41 = vld [vmem:[#allocation2 + $0x88] sm:$0xff] }
 0x5df   : > { %1330 = vst.msk [vmem:[#allocation2 + $0x90] sm:$0xff] %vm312_vm0, %v1326_v40  ;;  %2345 = vmatprep.subr.bf16.mxu1 %v1385_v41 }
 0x5e0   : > { %2346 = vmatpush3.bf16.msra.mxu1 %v1385_v41 }
 0x5e1   : > { %v1255_v35 = vpop.f32.mrb[28].mxu1 }
 0x5e2   : > { %1312 = vrot.lane.b32.xlu0 %v1266_v49, %s2625_s11  ;;  %v1257_v28 = vpop.f32.mrb[29].mxu1 }
 0x5e3   : > { %v1259_v44 = vpop.f32.mrb[30].mxu1 }
 0x5e4   : > { %v1267_v46 = vpack.c.bf16 %v1259_v44, %v1255_v35  ;;  %v1261_v48 = vpop.f32.mrb[31].mxu1 }
 0x5e5   : > { %v1327_v52 = vpack.c.bf16 %v1261_v48, %v1257_v28  ;;  %v1370_v10 = vld [vmem:[#allocation2 + $0x10] sm:$0xff] }
 0x5e6   : > { %1271 = vst.msk [vmem:[#allocation2 + $0x18] sm:$0xff] %vm312_vm0, %v1267_v46  ;;  %1314 = vrot.lane.b32.xlu0 %v1267_v46, %s2625_s11  ;;  %1298 = vrot.lane.b32.xlu1 %v1267_v46, %s2624_s10  ;;  %v1386_v55 = vld [vmem:[#allocation2 + $0x90] sm:$0xff]  ;;  %s3348_s10 = scalar_lea.vmem %s3400_s5, %s2189_s22 }
 0x5e7   : > { %1331 = vst.msk [vmem:[#allocation2 + $0x98] sm:$0xff] %vm312_vm0, %v1327_v52  ;;  %2347 = vmatprep.subr.bf16.mxu1 %v1386_v55 }
 0x5e8   : > { %2348 = vmatpush3.bf16.msra.mxu1 %v1386_v55 }
 0x5ea   : > { %1336 = vrot.lane.b32.xlu0 %v1324_v30, %s2626_s12  ;;  %1276 = vrot.lane.b32.xlu1 %v1264_v24, %s2626_s12  ;;  %v2452_v24 = vld [vmem:[%s2758_s9 + $0x18] ss:$12 sps:$4 sm:$0xff]   ;;  %v2455_v30 = vld [vmem:[%s2758_s9 + $0x34] ss:$12 sps:$4 sm:$0xff]  }
 0x5ed   : > { %v1371_v62 = vld [vmem:[#allocation2 + $0x18] sm:$0xff] }
 0x5ee   : > { %1340 = vrot.lane.b32.xlu0 %v1326_v40, %s2626_s12  ;;  %1278 = vrot.lane.b32.xlu1 %v1265_v32, %s2626_s12  ;;  %v1387_v56 = vld [vmem:[#allocation2 + $0x98] sm:$0xff] }
 0x5ef   : > { %2349 = vmatprep.subr.bf16.mxu1 %v1387_v56  ;;  %v2458_v32 = vld [vmem:[%s2758_s9 + $0x4c] ss:$12 sps:$4 sm:$0xff]  }
 0x5f0   : > { %2350 = vmatpush3.bf16.msra.mxu1 %v1387_v56 }
 0x5f2   : > { %1280 = vrot.lane.b32.xlu1 %v1266_v49, %s2626_s12 }
 0x5f6   : > { %1282 = vrot.lane.b32.xlu1 %v1267_v46, %s2626_s12 }
 0x5fa   : > { %1338 = vrot.lane.b32.xlu1 %v1325_v19, %s2626_s12  ;;  %v2461_v19 = vld [vmem:[%s2758_s9 + $0x48] ss:$12 sps:$4 sm:$0xff]  }
 0x5fe   : > { %1342 = vrot.lane.b32.xlu1 %v1327_v52, %s2626_s12 }
 0x640   : > { %v1293_v51 = vpop.permute.xlu1 %1292 }
 0x641   : > { %1304 = vst.msk [vmem:[#allocation2 + $0x40] sm:$0xff] %vm312_vm0, %v1293_v51 }
 0x648   : > { %v1295_v61 = vpop.permute.xlu0 %1294  ;;  %v1376_v63 = vld [vmem:[#allocation2 + $0x40] sm:$0xff] }
 0x649   : > { %1305 = vst.msk [vmem:[#allocation2 + $0x48] sm:$0xff] %vm312_vm0, %v1295_v61  ;;  %2249 = vmatprep.subr.bf16.mxu0 %v1376_v63 }
 0x64a   : > { %2250 = vmatpush3.bf16.msra.mxu0 %v1368_v53 }
 0x64c   : > { %v1309_v38 = vpop.permute.xlu0 %1308 }
 0x64d   : > { %1320 = vst.msk [vmem:[#allocation2 + $0x60] sm:$0xff] %vm312_vm0, %v1309_v38 }
 0x650   : > { %v1297_v2 = vpop.permute.xlu1 %1296  ;;  %v1311_v3 = vpop.permute.xlu0 %1310  ;;  %v1377_v4 = vld [vmem:[#allocation2 + $0x48] sm:$0xff] }
 0x651   : > { %1306 = vst.msk [vmem:[#allocation2 + $0x50] sm:$0xff] %vm312_vm0, %v1297_v2  ;;  %1321 = vst.msk [vmem:[#allocation2 + $0x68] sm:$0xff] %vm312_vm0, %v1311_v3  ;;  %2251 = vmatprep.subr.bf16.mxu0 %v1377_v4 }
 0x652   : > { %2252 = vmatpush3.bf16.msra.mxu0 %v1369_v5 }
 0x654   : > { %v1313_v6 = vpop.permute.xlu0 %1312  ;;  %v1380_v50 = vld [vmem:[#allocation2 + $0x60] sm:$0xff] }
 0x655   : > { %1322 = vst.msk [vmem:[#allocation2 + $0x70] sm:$0xff] %vm312_vm0, %v1313_v6 }
 0x658   : > { %v1299_v57 = vpop.permute.xlu1 %1298  ;;  %v1315_v42 = vpop.permute.xlu0 %1314  ;;  %v1378_v9 = vld [vmem:[#allocation2 + $0x50] sm:$0xff]  ;;  %v1381_v17 = vld [vmem:[#allocation2 + $0x68] sm:$0xff] }
 0x659   : > { %1307 = vst.msk [vmem:[#allocation2 + $0x58] sm:$0xff] %vm312_vm0, %v1299_v57  ;;  %1323 = vst.msk [vmem:[#allocation2 + $0x78] sm:$0xff] %vm312_vm0, %v1315_v42  ;;  %2253 = vmatprep.subr.bf16.mxu0 %v1378_v9 }
 0x65a   : > { %2254 = vmatpush3.bf16.msra.mxu0 %v1370_v10 }
 0x65c   : > { %v1277_v47 = vpop.permute.xlu1 %1276  ;;  %v1337_v59 = vpop.permute.xlu0 %1336  ;;  %v1382_v54 = vld [vmem:[#allocation2 + $0x70] sm:$0xff] }
 0x65d   : > { %1288 = vst.msk [vmem:[#allocation2 + $0x20] sm:$0xff] %vm312_vm0, %v1277_v47  ;;  %1348 = vst.msk [vmem:[#allocation2 + $0xa0] sm:$0xff] %vm312_vm0, %v1337_v59 }
 0x660   : > { %v1279_v11 = vpop.permute.xlu1 %1278  ;;  %v1341_v37 = vpop.permute.xlu0 %1340  ;;  %v1379_v12 = vld [vmem:[#allocation2 + $0x58] sm:$0xff] }
 0x661   : > { %1289 = vst.msk [vmem:[#allocation2 + $0x28] sm:$0xff] %vm312_vm0, %v1279_v11  ;;  %1350 = vst.msk [vmem:[#allocation2 + $0xb0] sm:$0xff] %vm312_vm0, %v1341_v37  ;;  %2255 = vmatprep.subr.bf16.mxu0 %v1379_v12  ;;  %v1383_v23 = vld [vmem:[#allocation2 + $0x78] sm:$0xff] }
 0x662   : > { %2256 = vmatpush3.bf16.msra.mxu0 %v1371_v62 }
 0x663   : > { %2257 = vmatprep.subr.bf16.mxu0 %v1380_v50 }
 0x664   : > { %v1281_v8 = vpop.permute.xlu1 %1280  ;;  %v1388_v13 = vld [vmem:[#allocation2 + $0xa0] sm:$0xff] }
 0x665   : > { %v1372_v16 = vld [vmem:[#allocation2 + $0x20] sm:$0xff]  ;;  %1290 = vst.msk [vmem:[#allocation2 + $0x30] sm:$0xff] %vm312_vm0, %v1281_v8  ;;  %2351 = vmatprep.subr.bf16.mxu1 %v1388_v13 }
 0x666   : > { %2258 = vmatpush3.bf16.msra.mxu0 %v1372_v16  ;;  %2352 = vmatpush3.bf16.msra.mxu1 %v1388_v13 }
 0x667   : > { %2259 = vmatprep.subr.bf16.mxu0 %v1381_v17 }
 0x668   : > { %v1283_v18 = vpop.permute.xlu1 %1282  ;;  %v1373_v21 = vld [vmem:[#allocation2 + $0x28] sm:$0xff]  ;;  %v1390_v60 = vld [vmem:[#allocation2 + $0xb0] sm:$0xff] }
 0x669   : > { %1291 = vst.msk [vmem:[#allocation2 + $0x38] sm:$0xff] %vm312_vm0, %v1283_v18 }
 0x66a   : > { %2260 = vmatpush3.bf16.msra.mxu0 %v1373_v21 }
 0x66b   : > { %2261 = vmatprep.subr.bf16.mxu0 %v1382_v54 }
 0x66c   : > { %v1339_v1 = vpop.permute.xlu1 %1338  ;;  %v1374_v22 = vld [vmem:[#allocation2 + $0x30] sm:$0xff] }
 0x66d   : > { %1349 = vst.msk [vmem:[#allocation2 + $0xa8] sm:$0xff] %vm312_vm0, %v1339_v1 }
 0x66e   : > { %2262 = vmatpush3.bf16.msra.mxu0 %v1374_v22 }
 0x66f   : > { %2263 = vmatprep.subr.bf16.mxu0 %v1383_v23 }
 0x670   : > { %v1343_v7 = vpop.permute.xlu1 %1342  ;;  %v1375_v25 = vld [vmem:[#allocation2 + $0x38] sm:$0xff] }
 0x671   : > { %1351 = vst.msk [vmem:[#allocation2 + $0xb8] sm:$0xff] %vm312_vm0, %v1343_v7 }
 0x672   : > { %2264 = vmatpush3.bf16.msra.mxu0 %v1375_v25 }
 0x674   : > { %v1389_v15 = vld [vmem:[#allocation2 + $0xa8] sm:$0xff] }
 0x675   : > { %2353 = vmatprep.subr.bf16.mxu1 %v1389_v15  ;;  %1489 = vmatmul.mubr.bf16.vlgmr.msra.gmra.mrb[32].mxu0 %v2447_v26 }
 0x676   : > { %2354 = vmatpush3.bf16.msra.mxu1 %v1389_v15  ;;  %1496 = vmatprep.mubr.bf16.mxu0 %v2450_v27 }
 0x677   : > { %2355 = vmatprep.subr.bf16.mxu1 %v1390_v60 }
 0x678   : > { %v1391_v29 = vld [vmem:[#allocation2 + $0xb8] sm:$0xff] }
 0x67a   : > { %2356 = vmatpush3.bf16.msra.mxu1 %v1390_v60 }
 0x67b   : > { %2357 = vmatprep.subr.bf16.mxu1 %v1391_v29 }
 0x67d   : > { %1497 = vmatmul.mubr.bf16.gmra.mrb[36].mxu0 %v2452_v24 }
 0x67e   : > { %2358 = vmatpush3.bf16.msra.mxu1 %v1391_v29  ;;  %1504 = vmatprep.mubr.bf16.mxu0 %v2455_v30 }
 0x681   : > { %2360 = vmatmul.mubr.bf16.vlgmr.msra.gmra.mrb[32].mxu1 %v2454_v0 }
 0x682   : > { %2363 = vmatprep.mubr.bf16.mxu1 %v2460_v34 }
 0x685   : > { %1505 = vmatmul.mubr.bf16.gmra.mrb[40].mxu0 %v2457_v31 }
 0x686   : > { %1512 = vmatprep.mubr.bf16.mxu0 %v2458_v32 }
 0x689   : > { %2364 = vmatmul.mubr.bf16.gmra.mrb[36].mxu1 %v2462_v45 }
 0x68d   : > { %1513 = vmatmul.mubr.bf16.gmra.mrb[44].mxu0 %v2461_v19 }
 0x748   : > { %v2265_v14 = vpop.f32.mrb[32].mxu0 }
 0x749   : > { %v2266_v33 = vpop.f32.mrb[33].mxu0 }
 0x74a   : > { %v2267_v36 = vadd.f32 %v2266_v33, %v2265_v14  ;;  %v2268_v20 = vpop.f32.mrb[34].mxu0  ;;  %v2463_v14 = vld [vmem:[#allocation5 + $0x10] sm:$0xff]   ;;  %v2464_v33 = vld [vmem:[#allocation5 + $0x18] sm:$0xff]  }
 0x74b   : > { %v2269_v49 = vpop.f32.mrb[35].mxu0  ;;  %2367 = vmatprep.subr.bf16.mxu1 %v2463_v14 }
 0x74c   : > { %v2270_v39 = vadd.f32 %v2269_v49, %v2268_v20  ;;  %2368 = vmatpush3.bf16.msra.mxu1 %v2463_v14 }
 0x74d   : > { %2369 = vmatprep.subr.bf16.mxu1 %v2464_v33 }
 0x750   : > { %v2271_v40 = vpop.f32.mrb[36].mxu0  ;;  %2370 = vmatpush3.bf16.msra.mxu1 %v2464_v33 }
 0x751   : > { %v2272_v41 = vpop.f32.mrb[37].mxu0 }
 0x752   : > { %v2273_v35 = vadd.f32 %v2272_v41, %v2271_v40  ;;  %v2274_v28 = vpop.f32.mrb[38].mxu0 }
 0x753   : > { %v2275_v44 = vpop.f32.mrb[39].mxu0 }
 0x754   : > { %v2276_v46 = vadd.f32 %v2275_v44, %v2274_v28  ;;  %v2361_v48 = vpop.f32.mrb[32].mxu1 }
 0x755   : > { %v3127_v52 = vadd.f32 %v2361_v48, %v2273_v35  ;;  %v1555_v55 = vpop.f32.mrb[33].mxu1 }
 0x756   : > { %v3129_v56 = vadd.f32 %v2267_v36, %v1555_v55  ;;  %v2362_v58 = vpop.f32.mrb[34].mxu1 }
 0x757   : > { %v3131_v43 = vadd.f32 %v2362_v58, %v2276_v46  ;;  %v1558_v51 = vpop.f32.mrb[35].mxu1  ;;  %v1622_v37 = vmul.f32 %v3127_v52, %v3127_v52  ;;  %v1594_v50 = vsel %vm312_vm0, %v3127_v52, 0.0 }
 0x758   : > { %v3133_v61 = vadd.f32 %v2270_v39, %v1558_v51  ;;  %v1588_v63 = vsel %vm312_vm0, %v3129_v56, 0.0  ;;  %v2277_v53 = vpop.f32.mrb[40].mxu0  ;;  %v1620_v5 = vmul.f32 %v3129_v56, %v3129_v56 }
 0x759   : > { %1589 = vadd.xlane.f32.xlu0 %v1588_v63  ;;  %v2278_v38 = vpop.f32.mrb[41].mxu0  ;;  %v1634_v18 = vsel %vm312_vm0, %v1622_v37, 0.0  ;;  %v1597_v1 = vsel %vm312_vm0, %v3131_v43, 0.0  ;;  %v1623_v22 = vmul.f32 %v3131_v43, %v3131_v43 }
 0x75a   : > { %v1591_v2 = vsel %vm312_vm0, %v3133_v61, 0.0  ;;  %v1621_v3 = vmul.f32 %v3133_v61, %v3133_v61  ;;  %v2279_v4 = vadd.f32 %v2278_v38, %v2277_v53  ;;  %v2280_v6 = vpop.f32.mrb[42].mxu0  ;;  %v1628_v59 = vsel %vm312_vm0, %v1620_v5, 0.0 }
 0x75b   : > { %1592 = vadd.xlane.f32.xlu1 %v1591_v2  ;;  %v2281_v57 = vpop.f32.mrb[43].mxu0  ;;  %v1637_v15 = vsel %vm312_vm0, %v1623_v22, 0.0 }
 0x75c   : > { %v1631_v42 = vsel %vm312_vm0, %v1621_v3, 0.0  ;;  %v2282_v9 = vadd.f32 %v2281_v57, %v2280_v6  ;;  %v2365_v10 = vpop.f32.mrb[36].mxu1 }
 0x75d   : > { %1632 = vadd.xlane.f32.xlu0 %v1631_v42  ;;  %v1571_v47 = vpop.f32.mrb[37].mxu1 }
 0x75e   : > { %v3145_v11 = vadd.f32 %v2279_v4, %v1571_v47  ;;  %v2366_v12 = vpop.f32.mrb[38].mxu1 }
 0x75f   : > { %1629 = vadd.xlane.f32.xlu1 %v1628_v59  ;;  %v1574_v62 = vpop.f32.mrb[39].mxu1 }
 0x760   : > { %v2283_v8 = vpop.f32.mrb[44].mxu0  ;;  %v3151_v13 = vadd.f32 %v2282_v9, %v1574_v62  ;;  %v1600_v25 = vsel %vm312_vm0, %v3145_v11, 0.0  ;;  %v1624_v26 = vmul.f32 %v3145_v11, %v3145_v11 }
 0x761   : > { %1595 = vadd.xlane.f32.xlu0 %v1594_v50  ;;  %v2284_v16 = vpop.f32.mrb[45].mxu0 }
 0x762   : > { %v2285_v17 = vadd.f32 %v2284_v16, %v2283_v8  ;;  %v2286_v21 = vpop.f32.mrb[46].mxu0  ;;  %v1640_v60 = vsel %vm312_vm0, %v1624_v26, 0.0  ;;  %v1603_v24 = vsel %vm312_vm0, %v3151_v13, 0.0  ;;  %v1625_v29 = vmul.f32 %v3151_v13, %v3151_v13  ;;  %v3197_v26 = vld [vmem:[%s3399_s4 + $0x4] ss:$0 sm:$0xff] }
 0x763   : > { %1635 = vadd.xlane.f32.xlu1 %v1634_v18  ;;  %v2287_v54 = vpop.f32.mrb[47].mxu0 }
 0x764   : > { %v3158_v23 = vadd.f32 %v2365_v10, %v2285_v17  ;;  %v2288_v7 = vadd.f32 %v2287_v54, %v2286_v21  ;;  %v1643_v34 = vsel %vm312_vm0, %v1625_v29, 0.0 }
 0x765   : > { %1598 = vadd.xlane.f32.xlu0 %v1597_v1 }
 0x766   : > { %v3164_v27 = vadd.f32 %v2366_v12, %v2288_v7  ;;  %v1606_v30 = vsel %vm312_vm0, %v3158_v23, 0.0  ;;  %v1626_v0 = vmul.f32 %v3158_v23, %v3158_v23 }
 0x767   : > { %1601 = vadd.xlane.f32.xlu1 %v1600_v25 }
 0x768   : > { %v1646_v31 = vsel %vm312_vm0, %v1626_v0, 0.0  ;;  %v1609_v32 = vsel %vm312_vm0, %v3164_v27, 0.0  ;;  %v1627_v45 = vmul.f32 %v3164_v27, %v3164_v27 }
 0x769   : > { %1638 = vadd.xlane.f32.xlu0 %v1637_v15 }
 0x76a   : > { %v1649_v19 = vsel %vm312_vm0, %v1627_v45, 0.0 }
 0x76b   : > { %1641 = vadd.xlane.f32.xlu1 %v1640_v60 }
 0x76d   : > { %1604 = vadd.xlane.f32.xlu0 %v1603_v24 }
 0x76f   : > { %1607 = vadd.xlane.f32.xlu1 %v1606_v30 }
 0x771   : > { %1644 = vadd.xlane.f32.xlu0 %v1643_v34 }
 0x773   : > { %1647 = vadd.xlane.f32.xlu1 %v1646_v31 }
 0x775   : > { %1610 = vadd.xlane.f32.xlu0 %v1609_v32 }
 0x779   : > { %1650 = vadd.xlane.f32.xlu0 %v1649_v19 }
 0x7e6   : > { %v1590_v36 = vpop.xlane.xlu0 %1589 }
 0x7e7   : > { %v1612_v49 = vmul.f32 0.03125, %v1590_v36 }
 0x7e8   : > { %v1593_v20 = vpop.xlane.xlu1 %1592 }
 0x7e9   : > { %v1613_v39 = vmul.f32 0.03125, %v1593_v20  ;;  %v1660_v44 = vmul.f32 %v1612_v49, %v1612_v49  ;;  %v1684_v24 = vsub.f32 %v3129_v56, %v1612_v49 }
 0x7ea   : > { %v1633_v40 = vpop.xlane.xlu0 %1632 }
 0x7eb   : > { %v1661_v41 = vmul.f32 %v1613_v39, %v1613_v39  ;;  %v1653_v35 = vmul.f32 0.03125, %v1633_v40  ;;  %v1685_v22 = vsub.f32 %v3133_v61, %v1613_v39  ;;  %v3205_v61 = vld [vmem:[%s3399_s4 + $0x5] ss:$0 sm:$0xff] }
 0x7ec   : > { %v1630_v28 = vpop.xlane.xlu1 %1629 }
 0x7ed   : > { %v1669_v46 = vsub.f32 %v1653_v35, %v1661_v41  ;;  %v1652_v48 = vmul.f32 0.03125, %v1630_v28 }
 0x7ee   : > { %v1596_v55 = vpop.xlane.xlu0 %1595 }
 0x7ef   : > { %v1677_v58 = vmax.f32 %v1669_v46, 0.0  ;;  %v1668_v51 = vsub.f32 %v1652_v48, %v1660_v44  ;;  %v1614_v63 = vmul.f32 0.03125, %v1596_v55 }
 0x7f0   : > { %v1636_v53 = vpop.xlane.xlu1 %1635 }
 0x7f1   : > { %v1693_v38 = vadd.f32 1e-05, %v1677_v58  ;;  %v1676_v2 = vmax.f32 %v1668_v51, 0.0  ;;  %v1662_v3 = vmul.f32 %v1614_v63, %v1614_v63  ;;  %v1654_v4 = vmul.f32 0.03125, %v1636_v53 }
 0x7f2   : > { %v1599_v5 = vpop.xlane.xlu0 %1598  ;;  %v1686_v41 = vsub.f32 %v3127_v52, %v1614_v63 }
 0x7f3   : > { %2497 = vrsqrt.f32 %v1693_v38  ;;  %v1692_v6 = vadd.f32 1e-05, %v1676_v2  ;;  %v3183_v57 = vmul.f32 0.03125, %v1599_v5  ;;  %v1670_v42 = vsub.f32 %v1654_v4, %v1662_v3 }
 0x7f4   : > { %v1602_v9 = vpop.xlane.xlu1 %1601 }
 0x7f5   : > { %2499 = vrsqrt.f32 %v1692_v6  ;;  %v3185_v10 = vmul.f32 0.03125, %v1602_v9  ;;  %v1678_v47 = vmax.f32 %v1670_v42, 0.0  ;;  %v1663_v37 = vmul.f32 %v3183_v57, %v3183_v57 }
 0x7f6   : > { %v1639_v59 = vpop.xlane.xlu0 %1638  ;;  %v1687_v52 = vsub.f32 %v3131_v43, %v3183_v57 }
 0x7f7   : > { %v1664_v12 = vmul.f32 %v3185_v10, %v3185_v10  ;;  %v1655_v62 = vmul.f32 0.03125, %v1639_v59  ;;  %v1694_v50 = vadd.f32 1e-05, %v1678_v47  ;;  %v1688_v47 = vsub.f32 %v3145_v11, %v3185_v10 }
 0x7f8   : > { %v1642_v8 = vpop.xlane.xlu1 %1641 }
 0x7f9   : > { %v1671_v16 = vsub.f32 %v1655_v62, %v1663_v37  ;;  %v1656_v17 = vmul.f32 0.03125, %v1642_v8  ;;  %2501 = vrsqrt.f32 %v1694_v50 }
 0x7fa   : > { %v1605_v18 = vpop.xlane.xlu0 %1604 }
 0x7fb   : > { %v1679_v21 = vmax.f32 %v1671_v16, 0.0  ;;  %v1672_v54 = vsub.f32 %v1656_v17, %v1664_v12  ;;  %v3191_v1 = vmul.f32 0.03125, %v1605_v18 }
 0x7fc   : > { %v1608_v7 = vpop.xlane.xlu1 %1607 }
 0x7fd   : > { %v2498_v25 = vpop.eup %2497  ;;  %v1695_v15 = vadd.f32 1e-05, %v1679_v21  ;;  %v1680_v60 = vmax.f32 %v1672_v54, 0.0  ;;  %v3200_v29 = vmul.f32 0.03125, %v1608_v7  ;;  %v1665_v32 = vmul.f32 %v3191_v1, %v3191_v1 }
 0x7fe   : > { %v1645_v30 = vpop.xlane.xlu0 %1644  ;;  %v1709_v0 = vmul.f32 %v2498_v25, %v1685_v22  ;;  %v1689_v57 = vsub.f32 %v3151_v13, %v3191_v1 }
 0x7ff   : > { %v2500_v34 = vpop.eup %2499  ;;  %2503 = vrsqrt.f32 %v1695_v15  ;;  %v1696_v31 = vadd.f32 1e-05, %v1680_v60  ;;  %v1657_v45 = vmul.f32 0.03125, %v1645_v30  ;;  %v1666_v33 = vmul.f32 %v3200_v29, %v3200_v29 }
 0x800   : > { %v1648_v19 = vpop.xlane.xlu1 %1647  ;;  %v1708_v14 = vmul.f32 %v2500_v34, %v1684_v24  ;;  %v1721_v56 = vmul.f32 %v3197_v26, %v1709_v0  ;;  %v1690_v21 = vsub.f32 %v3158_v23, %v3200_v29 }
 0x801   : > { %2505 = vrsqrt.f32 %v1696_v31  ;;  %v1673_v36 = vsub.f32 %v1657_v45, %v1665_v32  ;;  %v1658_v20 = vmul.f32 0.03125, %v1648_v19 }
 0x802   : > { %v1611_v49 = vpop.xlane.xlu0 %1610  ;;  %v1720_v39 = vmul.f32 %v3197_v26, %v1708_v14  ;;  %v1733_v40 = vadd.f32 %v3205_v61, %v1721_v56 }
 0x803   : > { %v1681_v35 = vmax.f32 %v1673_v36, 0.0  ;;  %v1674_v28 = vsub.f32 %v1658_v20, %v1666_v33  ;;  %v1619_v44 = vmul.f32 0.03125, %v1611_v49  ;;  %v2502_v46 = vpop.eup %2501 }
 0x804   : > { %v1732_v48 = vadd.f32 %v3205_v61, %v1720_v39  ;;  %v1710_v55 = vmul.f32 %v2502_v46, %v1686_v41  ;;  %v1741_v2 = vmax.f32 %v1733_v40, 0.0 }
 0x805   : > { %v1697_v58 = vadd.f32 1e-05, %v1681_v35  ;;  %v1682_v51 = vmax.f32 %v1674_v28, 0.0  ;;  %v1667_v4 = vmul.f32 %v1619_v44, %v1619_v44  ;;  %v1691_v1 = vsub.f32 %v3164_v27, %v1619_v44 }
 0x806   : > { %v1651_v53 = vpop.xlane.xlu0 %1650  ;;  %v1740_v38 = vmax.f32 %v1732_v48, 0.0  ;;  %v1722_v6 = vmul.f32 %v3197_v26, %v1710_v55 }
 0x807   : > { %2507 = vrsqrt.f32 %v1697_v58  ;;  %v1698_v3 = vadd.f32 1e-05, %v1682_v51  ;;  %v1659_v5 = vmul.f32 0.03125, %v1651_v53 }
 0x808   : > { %v1748_v63 = vpack.c.bf16 %v1741_v2, %v1740_v38  ;;  %v1734_v62 = vadd.f32 %v3205_v61, %v1722_v6 }
 0x809   : > { %v2504_v42 = vpop.eup %2503  ;;  %2509 = vrsqrt.f32 %v1698_v3  ;;  %v1675_v9 = vsub.f32 %v1659_v5, %v1667_v4 }
 0x80a   : > { %v1711_v59 = vmul.f32 %v2504_v42, %v1687_v52  ;;  %2371 = vmatprep.mubr.msk.bf16.mxu1 %vm312_vm0, %v1748_v63  ;;  %v1742_v17 = vmax.f32 %v1734_v62, 0.0 }
 0x80b   : > { %v2506_v37 = vpop.eup %2505  ;;  %v1683_v12 = vmax.f32 %v1675_v9, 0.0 }
 0x80c   : > { %v1723_v50 = vmul.f32 %v3197_v26, %v1711_v59  ;;  %v1712_v8 = vmul.f32 %v2506_v37, %v1688_v47 }
 0x80d   : > { %v1699_v16 = vadd.f32 1e-05, %v1683_v12 }
 0x80e   : > { %v1735_v43 = vadd.f32 %v3205_v61, %v1723_v50  ;;  %v1724_v11 = vmul.f32 %v3197_v26, %v1712_v8 }
 0x80f   : > { %2511 = vrsqrt.f32 %v1699_v16 }
 0x810   : > { %v1743_v18 = vmax.f32 %v1735_v43, 0.0  ;;  %v1736_v15 = vadd.f32 %v3205_v61, %v1724_v11 }
 0x811   : > { %v2508_v10 = vpop.eup %2507 }
 0x812   : > { %v1749_v54 = vpack.c.bf16 %v1743_v18, %v1742_v17  ;;  %v1713_v22 = vmul.f32 %v2508_v10, %v1689_v57  ;;  %v1744_v24 = vmax.f32 %v1736_v15, 0.0 }
 0x813   : > { %v2510_v7 = vpop.eup %2509 }
 0x814   : > { %2372 = vmatmul.mubr.msk.bf16.vlgmr.msra.gmra.mrb[40].mxu1 %vm312_vm0, %v1749_v54  ;;  %v1725_v25 = vmul.f32 %v3197_v26, %v1713_v22  ;;  %v1714_v60 = vmul.f32 %v2510_v7, %v1690_v21 }
 0x816   : > { %v1737_v13 = vadd.f32 %v3205_v61, %v1725_v25  ;;  %v1726_v0 = vmul.f32 %v3197_v26, %v1714_v60 }
 0x818   : > { %v1745_v30 = vmax.f32 %v1737_v13, 0.0  ;;  %v1738_v32 = vadd.f32 %v3205_v61, %v1726_v0 }
 0x819   : > { %v2512_v34 = vpop.eup %2511 }
 0x81a   : > { %v1750_v23 = vpack.c.bf16 %v1745_v30, %v1744_v24  ;;  %v1715_v29 = vmul.f32 %v2512_v34, %v1691_v1  ;;  %v1746_v19 = vmax.f32 %v1738_v32, 0.0 }
 0x81c   : > { %2375 = vmatprep.mubr.msk.bf16.mxu1 %vm312_vm0, %v1750_v23  ;;  %v1727_v31 = vmul.f32 %v3197_v26, %v1715_v29 }
 0x81e   : > { %v1739_v45 = vadd.f32 %v3205_v61, %v1727_v31 }
 0x820   : > { %v1747_v14 = vmax.f32 %v1739_v45, 0.0 }
 0x822   : > { %v1751_v56 = vpack.c.bf16 %v1747_v14, %v1746_v19 }
 0x824   : > { %2376 = vmatmul.mubr.msk.bf16.gmra.mrb[44].mxu1 %vm312_vm0, %v1751_v56 }
 0x8e7   : > { %v3241_v27 = vpop.f32.mrb[40].mxu1 }
 0x8e8   : > { %v3243_v33 = vpop.f32.mrb[41].mxu1  ;;  %v1854_v36 = vsel %vm312_vm0, %v3241_v27, 0.0  ;;  %v1882_v39 = vmul.f32 %v3241_v27, %v3241_v27 }
 0x8e9   : > { %1855 = vadd.xlane.f32.xlu1 %v1854_v36  ;;  %v3247_v20 = vpop.f32.mrb[42].mxu1  ;;  %v1848_v49 = vsel %vm312_vm0, %v3243_v33, 0.0  ;;  %v1880_v28 = vmul.f32 %v3243_v33, %v3243_v33 }
 0x8ea   : > { %v3249_v26 = vpop.f32.mrb[43].mxu1  ;;  %v1857_v61 = vsel %vm312_vm0, %v3247_v20, 0.0  ;;  %v1883_v41 = vmul.f32 %v3247_v20, %v3247_v20  ;;  %v1894_v35 = vsel %vm312_vm0, %v1882_v39, 0.0 }
 0x8eb   : > { %1858 = vadd.xlane.f32.xlu0 %v1857_v61  ;;  %v1851_v40 = vsel %vm312_vm0, %v3249_v26, 0.0  ;;  %v1881_v46 = vmul.f32 %v3249_v26, %v3249_v26  ;;  %v1888_v48 = vsel %vm312_vm0, %v1880_v28, 0.0 }
 0x8ec   : > { %v1897_v44 = vsel %vm312_vm0, %v1883_v41, 0.0 }
 0x8ed   : > { %1849 = vadd.xlane.f32.xlu1 %v1848_v49  ;;  %v1891_v55 = vsel %vm312_vm0, %v1881_v46, 0.0 }
 0x8ef   : > { %1852 = vadd.xlane.f32.xlu0 %v1851_v40 }
 0x8f1   : > { %1895 = vadd.xlane.f32.xlu1 %v1894_v35 }
 0x8f3   : > { %1898 = vadd.xlane.f32.xlu0 %v1897_v44 }
 0x8f5   : > { %1889 = vadd.xlane.f32.xlu1 %v1888_v48 }
 0x8f7   : > { %1892 = vadd.xlane.f32.xlu0 %v1891_v55  ;;  %v3269_v58 = vpop.f32.mrb[44].mxu1 }
 0x8f8   : > { %v3271_v51 = vpop.f32.mrb[45].mxu1  ;;  %v1866_v53 = vsel %vm312_vm0, %v3269_v58, 0.0  ;;  %v1886_v42 = vmul.f32 %v3269_v58, %v3269_v58 }
 0x8f9   : > { %1867 = vadd.xlane.f32.xlu1 %v1866_v53  ;;  %v3275_v38 = vpop.f32.mrb[46].mxu1  ;;  %v1860_v4 = vsel %vm312_vm0, %v3271_v51, 0.0  ;;  %v1884_v5 = vmul.f32 %v3271_v51, %v3271_v51 }
 0x8fa   : > { %v3277_v2 = vpop.f32.mrb[47].mxu1  ;;  %v1869_v3 = vsel %vm312_vm0, %v3275_v38, 0.0  ;;  %v1887_v47 = vmul.f32 %v3275_v38, %v3275_v38  ;;  %v1906_v59 = vsel %vm312_vm0, %v1886_v42, 0.0 }
 0x8fb   : > { %1870 = vadd.xlane.f32.xlu0 %v1869_v3  ;;  %v1885_v6 = vmul.f32 %v3277_v2, %v3277_v2  ;;  %v1863_v52 = vsel %vm312_vm0, %v3277_v2, 0.0  ;;  %v1900_v63 = vsel %vm312_vm0, %v1884_v5, 0.0 }
 0x8fc   : > { %v1909_v37 = vsel %vm312_vm0, %v1887_v47, 0.0 }
 0x8fd   : > { %1861 = vadd.xlane.f32.xlu1 %v1860_v4  ;;  %v1903_v9 = vsel %vm312_vm0, %v1885_v6, 0.0  ;;  %v3319_v4 = vld [vmem:[%s3399_s4 + $0x6] ss:$0 sm:$0xff] }
 0x8ff   : > { %1864 = vadd.xlane.f32.xlu0 %v1863_v52 }
 0x901   : > { %1901 = vadd.xlane.f32.xlu1 %v1900_v63 }
 0x903   : > { %1904 = vadd.xlane.f32.xlu0 %v1903_v9 }
 0x905   : > { %1907 = vadd.xlane.f32.xlu1 %v1906_v59 }
 0x907   : > { %1910 = vadd.xlane.f32.xlu0 %v1909_v37 }
 0x976   : > { %v1856_v12 = vpop.xlane.xlu1 %1855 }
 0x977   : > { %v1874_v8 = vmul.f32 0.03125, %v1856_v12 }
 0x978   : > { %v1859_v62 = vpop.xlane.xlu0 %1858 }
 0x979   : > { %v1875_v43 = vmul.f32 0.03125, %v1859_v62  ;;  %v1922_v17 = vmul.f32 %v1874_v8, %v1874_v8  ;;  %v1946_v48 = vsub.f32 %v3241_v27, %v1874_v8  ;;  %v3327_v27 = vld [vmem:[%s3399_s4 + $0x7] ss:$0 sm:$0xff] }
 0x97a   : > { %v1850_v50 = vpop.xlane.xlu1 %1849 }
 0x97b   : > { %v3297_v18 = vmul.f32 0.03125, %v1850_v50  ;;  %v1923_v54 = vmul.f32 %v1875_v43, %v1875_v43  ;;  %v1947_v63 = vsub.f32 %v3247_v20, %v1875_v43 }
 0x97c   : > { %v1853_v16 = vpop.xlane.xlu0 %1852 }
 0x97d   : > { %v3299_v10 = vmul.f32 0.03125, %v1853_v16  ;;  %v1920_v15 = vmul.f32 %v3297_v18, %v3297_v18  ;;  %v1944_v50 = vsub.f32 %v3243_v33, %v3297_v18 }
 0x97e   : > { %v1896_v57 = vpop.xlane.xlu1 %1895 }
 0x97f   : > { %v1914_v11 = vmul.f32 0.03125, %v1896_v57  ;;  %v1921_v24 = vmul.f32 %v3299_v10, %v3299_v10 }
 0x980   : > { %v1899_v21 = vpop.xlane.xlu0 %1898 }
 0x981   : > { %v1930_v22 = vsub.f32 %v1914_v11, %v1922_v17  ;;  %v1915_v7 = vmul.f32 0.03125, %v1899_v21 }
 0x982   : > { %v1890_v25 = vpop.xlane.xlu1 %1889 }
 0x983   : > { %v1938_v60 = vmax.f32 %v1930_v22, 0.0  ;;  %v1931_v13 = vsub.f32 %v1915_v7, %v1923_v54  ;;  %v1912_v1 = vmul.f32 0.03125, %v1890_v25  ;;  %v1945_v22 = vsub.f32 %v3249_v26, %v3299_v10 }
 0x984   : > { %v1893_v30 = vpop.xlane.xlu0 %1892 }
 0x985   : > { %v1954_v0 = vadd.f32 1e-05, %v1938_v60  ;;  %v1939_v34 = vmax.f32 %v1931_v13, 0.0  ;;  %v1928_v23 = vsub.f32 %v1912_v1, %v1920_v15  ;;  %v1913_v29 = vmul.f32 0.03125, %v1893_v30  ;;  %v2537_v1 = vld [vmem:[%s2750_s30 + $0x10] sm:$0xff] }
 0x986   : > { %v1868_v31 = vpop.xlane.xlu1 %1867 }
 0x987   : > { %2513 = vrsqrt.f32 %v1954_v0  ;;  %v1955_v32 = vadd.f32 1e-05, %v1939_v34  ;;  %v1936_v45 = vmax.f32 %v1928_v23, 0.0  ;;  %v1929_v19 = vsub.f32 %v1913_v29, %v1921_v24  ;;  %v2538_v29 = vld [vmem:[%s2750_s30 + $0x18] sm:$0xff] }
 0x988   : > { %v1871_v14 = vpop.xlane.xlu0 %1870  ;;  %v3309_v28 = vmul.f32 0.03125, %v1868_v31 }
 0x989   : > { %2515 = vrsqrt.f32 %v1955_v32  ;;  %v1952_v56 = vadd.f32 1e-05, %v1936_v45  ;;  %v1937_v36 = vmax.f32 %v1929_v19, 0.0  ;;  %v3314_v55 = vmul.f32 0.03125, %v1871_v14 }
 0x98a   : > { %v1862_v61 = vpop.xlane.xlu1 %1861  ;;  %v1926_v59 = vmul.f32 %v3309_v28, %v3309_v28 }
 0x98b   : > { %2517 = vrsqrt.f32 %v1952_v56  ;;  %v1953_v49 = vadd.f32 1e-05, %v1937_v36  ;;  %v3305_v39 = vmul.f32 0.03125, %v1862_v61  ;;  %v1927_v16 = vmul.f32 %v3314_v55, %v3314_v55  ;;  %v2539_v56 = vld [vmem:[%s2750_s30] sm:$0xff] }
 0x98c   : > { %v1865_v40 = vpop.xlane.xlu0 %1864 }
 0x98d   : > { %2519 = vrsqrt.f32 %v1953_v49  ;;  %v3307_v41 = vmul.f32 0.03125, %v1865_v40  ;;  %v1924_v44 = vmul.f32 %v3305_v39, %v3305_v39  ;;  %v2540_v40 = vld [vmem:[%s2750_s30 + $0x8] sm:$0xff] }
 0x98e   : > { %v1902_v35 = vpop.xlane.xlu1 %1901 }
 0x98f   : > { %v1916_v46 = vmul.f32 0.03125, %v1902_v35  ;;  %v1925_v5 = vmul.f32 %v3307_v41, %v3307_v41 }
 0x990   : > { %v1905_v53 = vpop.xlane.xlu0 %1904 }
 0x991   : > { %v2514_v3 = vpop.eup %2513  ;;  %v1932_v6 = vsub.f32 %v1916_v46, %v1924_v44  ;;  %v1917_v52 = vmul.f32 0.03125, %v1905_v53  ;;  %v1948_v46 = vsub.f32 %v3271_v51, %v3305_v39  ;;  %v1949_v53 = vsub.f32 %v3277_v2, %v3307_v41 }
 0x992   : > { %v1970_v42 = vmul.f32 %v2514_v3, %v1946_v48  ;;  %v1908_v9 = vpop.xlane.xlu1 %1907  ;;  %v1951_v51 = vsub.f32 %v3275_v38, %v3314_v55  ;;  %v2542_v38 = vld [vmem:[%s2750_s30 + $0x28] sm:$0xff] }
 0x993   : > { %v2516_v47 = vpop.eup %2515  ;;  %v1940_v37 = vmax.f32 %v1932_v6, 0.0  ;;  %v1933_v12 = vsub.f32 %v1917_v52, %v1925_v5  ;;  %v1918_v62 = vmul.f32 0.03125, %v1908_v9  ;;  %v1950_v6 = vsub.f32 %v3269_v58, %v3309_v28 }
 0x994   : > { %v1982_v8 = vmul.f32 %v3319_v4, %v1970_v42  ;;  %v1971_v20 = vmul.f32 %v2516_v47, %v1947_v63  ;;  %v1911_v43 = vpop.xlane.xlu0 %1910  ;;  %v2541_v47 = vld [vmem:[%s2750_s30 + $0x20] sm:$0xff] }
 0x995   : > { %v2518_v57 = vpop.eup %2517  ;;  %v1956_v17 = vadd.f32 1e-05, %v1940_v37  ;;  %v1941_v11 = vmax.f32 %v1933_v12, 0.0  ;;  %v1934_v21 = vsub.f32 %v1918_v62, %v1926_v59  ;;  %v1919_v54 = vmul.f32 0.03125, %v1911_v43 }
 0x996   : > { %v1994_v7 = vadd.f32 %v3327_v27, %v1982_v8  ;;  %v1983_v33 = vmul.f32 %v3319_v4, %v1971_v20  ;;  %v1968_v18 = vmul.f32 %v2518_v57, %v1944_v50  ;;  %v2543_v20 = vld [vmem:[%s2750_s30 + $0x30] sm:$0xff] }
 0x997   : > { %v2520_v25 = vpop.eup %2519  ;;  %2521 = vrsqrt.f32 %v1956_v17  ;;  %v1957_v15 = vadd.f32 1e-05, %v1941_v11  ;;  %v1942_v60 = vmax.f32 %v1934_v21, 0.0  ;;  %v1935_v13 = vsub.f32 %v1919_v54, %v1927_v16  ;;  %v2544_v17 = vld [vmem:[%s2750_s30 + $0x38] sm:$0xff] }
 0x998   : > { %v2002_v24 = vadd.f32 %v2537_v1, %v1994_v7  ;;  %v1995_v30 = vadd.f32 %v3327_v27, %v1983_v33  ;;  %v1980_v0 = vmul.f32 %v3319_v4, %v1968_v18  ;;  %v1969_v34 = vmul.f32 %v2520_v25, %v1945_v22 }
 0x999   : > { %2523 = vrsqrt.f32 %v1957_v15  ;;  %v1958_v26 = vadd.f32 1e-05, %v1942_v60  ;;  %v1943_v10 = vmax.f32 %v1935_v13, 0.0 }
 0x99a   : > { %v2010_v23 = vmax.f32 %v2002_v24, 0.0  ;;  %v2003_v31 = vadd.f32 %v2538_v29, %v1995_v30  ;;  %v1992_v32 = vadd.f32 %v3327_v27, %v1980_v0  ;;  %v1981_v45 = vmul.f32 %v3319_v4, %v1969_v34 }
 0x99b   : > { %2525 = vrsqrt.f32 %v1958_v26  ;;  %v1959_v19 = vadd.f32 1e-05, %v1943_v10 }
 0x99c   : > { %2018 = vst.msk [vmem:[%s3348_s10 + $0x10] sm:$0xff] %vm312_vm0, %v2010_v23  ;;  %v2011_v14 = vmax.f32 %v2003_v31, 0.0  ;;  %v2000_v36 = vadd.f32 %v2539_v56, %v1992_v32  ;;  %v1993_v61 = vadd.f32 %v3327_v27, %v1981_v45 }
 0x99d   : > { %2527 = vrsqrt.f32 %v1959_v19 }
 0x99e   : > { %2019 = vst.msk [vmem:[%s3348_s10 + $0x18] sm:$0xff] %vm312_vm0, %v2011_v14  ;;  %v2008_v49 = vmax.f32 %v2000_v36, 0.0  ;;  %v2001_v35 = vadd.f32 %v2540_v40, %v1993_v61 }
 0x9a0   : > { %2016 = vst.msk [vmem:[%s3348_s10] sm:$0xff] %vm312_vm0, %v2008_v49  ;;  %v2009_v44 = vmax.f32 %v2001_v35, 0.0 }
 0x9a1   : > { %v2522_v48 = vpop.eup %2521 }
 0x9a2   : > { %2017 = vst.msk [vmem:[%s3348_s10 + $0x8] sm:$0xff] %vm312_vm0, %v2009_v44  ;;  %v1972_v3 = vmul.f32 %v2522_v48, %v1948_v46 }
 0x9a3   : > { %v2524_v5 = vpop.eup %2523 }
 0x9a4   : > { %v1984_v52 = vmul.f32 %v3319_v4, %v1972_v3  ;;  %v1973_v63 = vmul.f32 %v2524_v5, %v1949_v53 }
 0x9a5   : > { %v2526_v42 = vpop.eup %2525 }
 0x9a6   : > { %v1996_v39 = vadd.f32 %v3327_v27, %v1984_v52  ;;  %v1985_v9 = vmul.f32 %v3319_v4, %v1973_v63  ;;  %v1974_v2 = vmul.f32 %v2526_v42, %v1950_v6 }
 0x9a7   : > { %v2528_v41 = vpop.eup %2527 }
 0x9a8   : > { %v2004_v59 = vadd.f32 %v2541_v47, %v1996_v39  ;;  %v1997_v58 = vadd.f32 %v3327_v27, %v1985_v9  ;;  %v1986_v28 = vmul.f32 %v3319_v4, %v1974_v2  ;;  %v1975_v37 = vmul.f32 %v2528_v41, %v1951_v51 }
 0x9aa   : > { %v2012_v12 = vmax.f32 %v2004_v59, 0.0  ;;  %v2005_v55 = vadd.f32 %v2542_v38, %v1997_v58  ;;  %v1998_v62 = vadd.f32 %v3327_v27, %v1986_v28  ;;  %v1987_v50 = vmul.f32 %v3319_v4, %v1975_v37 }
 0x9ac   : > { %2020 = vst.msk [vmem:[%s3348_s10 + $0x20] sm:$0xff] %vm312_vm0, %v2012_v12  ;;  %v2013_v8 = vmax.f32 %v2005_v55, 0.0  ;;  %v2006_v16 = vadd.f32 %v2543_v20, %v1998_v62  ;;  %v1999_v43 = vadd.f32 %v3327_v27, %v1987_v50 }
 0x9ae   : > { %2021 = vst.msk [vmem:[%s3348_s10 + $0x28] sm:$0xff] %vm312_vm0, %v2013_v8  ;;  %v2014_v57 = vmax.f32 %v2006_v16, 0.0  ;;  %v2007_v11 = vadd.f32 %v2544_v17, %v1999_v43 }
 0x9b0   : > { %2022 = vst.msk [vmem:[%s3348_s10 + $0x30] sm:$0xff] %vm312_vm0, %v2014_v57  ;;  %v2015_v21 = vmax.f32 %v2007_v11, 0.0 }
 0x9b2   : > { %2023 = vst.msk [vmem:[%s3348_s10 + $0x38] sm:$0xff] %vm312_vm0, %v2015_v21 }
 0x9b3 PF: > { %s17_s18 = sadd.s32 1, %s2615_s18  }
 0x9b4   : > { %p14_p5 = scmp.ge.s32.totalorder %s17_s18, 4  }
 0x9b6   :  { %16 = sbr.rel (!%p14_p5) target bundleno = 2 (0x2), region = 84 }
 0x9bd   :  { %2045 = vsyncpa [#allocation4], 1 }
 0x9be   :  { %2047 = vsyncpa [#allocation4 + $0x1], 1 }
 0x9bf   :  { %2048 = vsyncpa [#allocation6], 1 }

</bundles_post_ra>
